<compile_context>
chip_gen: v6e
topology: v6e:2x2x1
jax: 0.10.0
libtpu: 0.0.40
codegen_flags: <defaults>
</compile_context>

<pallas_src>
import functools
import math

import jax
import jax.numpy as jnp
from jax.experimental import pallas as pl
from jax.experimental.pallas import tpu as pltpu

MLP_SCALE = 4
LN_EPS = 1e-5
GELU_C = 0.7978845608028654  # sqrt(2/pi)


# ---------------------------------------------------------------------------
# Fused kernel: LN1 + causal attention + residual + LN2 + MLP + residual
# (one batch element per grid step; heads statically unrolled)
# ---------------------------------------------------------------------------
def vanilla_block_kernel(x_ref, g1_ref, b1_ref, wk_ref, wq_ref, wv_ref, wo_ref,
                         bo_ref, g2_ref, b2_ref, wfc_ref, bfc_ref, wp_ref,
                         o_ref, *, n_head, scale):
    x = x_ref[0]                                   # (T, C) float32
    T, C = x.shape

    # ---- LayerNorm 1 (f32) ----
    mu = jnp.mean(x, axis=-1, keepdims=True)
    xc = x - mu
    var = jnp.mean(xc * xc, axis=-1, keepdims=True)
    y = xc * jax.lax.rsqrt(var + LN_EPS) * g1_ref[...] + b1_ref[...]
    yb = y.astype(jnp.bfloat16)                    # bf16 MXU inputs, f32 accum

    # causal mask: query t attends to keys <= t
    row = jax.lax.broadcasted_iota(jnp.int32, (T, T), 0)
    col = jax.lax.broadcasted_iota(jnp.int32, (T, T), 1)
    causal = row >= col

    # ---- per-head attention, output projection folded into the accumulator ----
    acc = jnp.zeros((T, C), jnp.float32)
    for h in range(n_head):                        # static unroll over heads
        kh = jnp.dot(yb, wk_ref[h], preferred_element_type=jnp.float32)   # (T,hd)
        qh = jnp.dot(yb, wq_ref[h], preferred_element_type=jnp.float32)   # (T,hd)
        vh = jnp.dot(yb, wv_ref[h], preferred_element_type=jnp.float32)   # (T,hd)
        qh = qh * scale                            # fold scale into the small tile

        s = jax.lax.dot_general(                   # q @ k^T (rhs-transposed dot)
            qh.astype(jnp.bfloat16), kh.astype(jnp.bfloat16),
            (((1,), (1,)), ((), ())),
            preferred_element_type=jnp.float32)                           # (T,T)
        s = jnp.where(causal, s, -1e30)
        m = jnp.max(s, axis=-1, keepdims=True)
        p = jnp.exp(s - m)                         # unnormalized probabilities
        l = jnp.sum(p, axis=-1, keepdims=True)

        oh = jnp.dot(p.astype(jnp.bfloat16), vh.astype(jnp.bfloat16),
                     preferred_element_type=jnp.float32)                  # (T,hd)
        oh = oh * (1.0 / l)                        # normalize after P@V (smaller tile)

        # fold this head's slice of the output projection in directly
        acc = acc + jnp.dot(oh.astype(jnp.bfloat16), wo_ref[h],
                            preferred_element_type=jnp.float32)           # (T,C)

    x2 = x + acc + bo_ref[...]                     # first residual

    # ---- LayerNorm 2 + MLP + second residual (uses y = ln_1(x)!) ----
    mu2 = jnp.mean(x2, axis=-1, keepdims=True)
    xc2 = x2 - mu2
    var2 = jnp.mean(xc2 * xc2, axis=-1, keepdims=True)
    z = xc2 * jax.lax.rsqrt(var2 + LN_EPS) * g2_ref[...] + b2_ref[...]

    hmid = jnp.dot(z.astype(jnp.bfloat16), wfc_ref[...],
                   preferred_element_type=jnp.float32) + bfc_ref[...]     # (T,4C)
    hmid = 0.5 * hmid * (1.0 + jnp.tanh(GELU_C * (hmid + 0.044715 * hmid * hmid * hmid)))
    mlp = jnp.dot(hmid.astype(jnp.bfloat16), wp_ref[...],
                  preferred_element_type=jnp.float32)                     # (T,C)

    o_ref[0] = y + mlp


# ---------------------------------------------------------------------------
# Wrapper
# ---------------------------------------------------------------------------
def vanilla_block_forward(x, p, *, n_head):
    """x: (B, T, C) float32 -> (B, T, C) float32 (tensor output of VanillaBlock)."""
    B, T, C = x.shape
    H = p["wfc_bf"].shape[1]
    hd = C // n_head
    scale = 1.0 / math.sqrt(hd)

    cparams = pltpu.CompilerParams(
        dimension_semantics=("parallel",),
        vmem_limit_bytes=48 * 1024 * 1024,
    )
    cost = pl.CostEstimate(
        flops=int(B * (24 * T * C * C + 4 * T * T * C)),
        transcendentals=int(B * (n_head * T * T + T * H + 2 * T)),
        bytes_accessed=int(2 * B * T * C * 4 + 12 * C * C * 2 + (H + 5 * C) * 4),
    )

    out = pl.pallas_call(
        functools.partial(vanilla_block_kernel, n_head=n_head, scale=scale),
        grid=(B,),
        in_specs=[
            pl.BlockSpec((1, T, C), lambda b: (b, 0, 0)),        # x
            pl.BlockSpec((1, C), lambda b: (0, 0)),              # ln_1 gamma
            pl.BlockSpec((1, C), lambda b: (0, 0)),              # ln_1 beta
            pl.BlockSpec((n_head, C, hd), lambda b: (0, 0, 0)),  # Wk per head
            pl.BlockSpec((n_head, C, hd), lambda b: (0, 0, 0)),  # Wq per head
            pl.BlockSpec((n_head, C, hd), lambda b: (0, 0, 0)),  # Wv per head
            pl.BlockSpec((n_head, hd, C), lambda b: (0, 0, 0)),  # Wo per head
            pl.BlockSpec((1, C), lambda b: (0, 0)),              # bo
            pl.BlockSpec((1, C), lambda b: (0, 0)),              # ln_2 gamma
            pl.BlockSpec((1, C), lambda b: (0, 0)),              # ln_2 beta
            pl.BlockSpec((C, H), lambda b: (0, 0)),              # W_fc
            pl.BlockSpec((1, H), lambda b: (0, 0)),              # b_fc
            pl.BlockSpec((H, C), lambda b: (0, 0)),              # W_proj (mlp)
        ],
        out_specs=pl.BlockSpec((1, T, C), lambda b: (b, 0, 0)),
        out_shape=jax.ShapeDtypeStruct((B, T, C), jnp.float32),
        compiler_params=cparams,
        cost_estimate=cost,
    )(x, p["g1"], p["b1"], p["wk_h"], p["wq_h"], p["wv_h"], p["wo_h"], p["bo"],
      p["g2"], p["b2"], p["wfc_bf"], p["bfc"], p["wp2_bf"])

    return out


# ---------------------------------------------------------------------------
# Parameters (synthetic, shapes matching VanillaBlock; weights stored (in, out))
# ---------------------------------------------------------------------------
def init_params(key, n_embd):
    C = n_embd
    H = MLP_SCALE * C
    ks = jax.random.split(key, 11)
    nrm = lambda k, shape, s: s * jax.random.normal(k, shape, jnp.float32)
    return dict(
        g1=1.0 + nrm(ks[0], (1, C), 0.02),                  # ln_1 weight
        b1=nrm(ks[1], (1, C), 0.02),                        # ln_1 bias
        wkq=nrm(ks[2], (C, 2 * C), 1.0 / math.sqrt(C)),     # c_attn (k | q), no bias
        wv=nrm(ks[3], (C, C), 1.0 / math.sqrt(C)),          # c_attn_value, no bias
        wo=nrm(ks[4], (C, C), 1.0 / math.sqrt(C)),          # attn c_proj weight
        bo=nrm(ks[5], (1, C), 0.02),                        # attn c_proj bias
        g2=1.0 + nrm(ks[6], (1, C), 0.02),                  # ln_2 weight
        b2=nrm(ks[7], (1, C), 0.02),                        # ln_2 bias
        wfc=nrm(ks[8], (C, H), 1.0 / math.sqrt(C)),         # mlp c_fc weight
        bfc=nrm(ks[9], (1, H), 0.02),                       # mlp c_fc bias
        wp2=nrm(ks[10], (H, C), 1.0 / math.sqrt(H)),        # mlp c_proj (no bias)
    )


def prepare_params(p, n_head):
    """One-time wrapper-side prep: cast matmul weights to bf16 (MXU inputs) and
    pre-split attention weights per head. LN params / biases stay f32."""
    C = p["wv"].shape[0]
    hd = C // n_head
    wkq = p["wkq"].astype(jnp.bfloat16)
    wv = p["wv"].astype(jnp.bfloat16)
    wo = p["wo"].astype(jnp.bfloat16)
    wk, wq = wkq[:, :C], wkq[:, C:]          # spec: c_attn output splits (k, q)

    def split_in(w):                          # (C, C) -> (n_head, C, hd)
        return w.reshape(C, n_head, hd).transpose(1, 0, 2)

    q = dict(p)
    q.update(
        wkq_bf=wkq, wv_bf=wv, wo_bf=wo,
        wk_h=split_in(wk), wq_h=split_in(wq), wv_h=split_in(wv),
        wo_h=wo.reshape(n_head, hd, C),
        wfc_bf=p["wfc"].astype(jnp.bfloat16),
        wp2_bf=p["wp2"].astype(jnp.bfloat16),
    )
    return q


# ---------------------------------------------------------------------------
# Pure-JAX reference with the same numerics (bf16 dot inputs, f32 accumulation,
# scale folded into Q, softmax normalization applied after P@V)
# ---------------------------------------------------------------------------
def ref_vanilla_block(x, p, *, n_head):
    B, T, C = x.shape
    hd = C // n_head
    scale = 1.0 / math.sqrt(hd)

    def ln(u, g, b):
        mu = jnp.mean(u, axis=-1, keepdims=True)
        uc = u - mu
        var = jnp.mean(uc * uc, axis=-1, keepdims=True)
        return uc * jax.lax.rsqrt(var + LN_EPS) * g + b

    y = ln(x, p["g1"], p["b1"])
    yb = y.astype(jnp.bfloat16)
    kq = jnp.matmul(yb, p["wkq_bf"], preferred_element_type=jnp.float32)
    v = jnp.matmul(yb, p["wv_bf"], preferred_element_type=jnp.float32)
    k, q = kq[..., :C], kq[..., C:]

    def heads(u):                                  # (B,T,C) -> (B,nh,T,hd)
        return u.reshape(B, T, n_head, hd).transpose(0, 2, 1, 3)

    qh = (heads(q) * scale).astype(jnp.bfloat16)
    kh = heads(k).astype(jnp.bfloat16)
    vh = heads(v).astype(jnp.bfloat16)
    s = jnp.einsum("bhqd,bhkd->bhqk", qh, kh, preferred_element_type=jnp.float32)
    causal = jnp.tril(jnp.ones((T, T), dtype=bool))
    s = jnp.where(causal[None, None], s, -1e30)
    m = jnp.max(s, axis=-1, keepdims=True)
    pr = jnp.exp(s - m)
    l = jnp.sum(pr, axis=-1, keepdims=True)
    att = jnp.einsum("bhqk,bhkd->bhqd", pr.astype(jnp.bfloat16), vh,
                     preferred_element_type=jnp.float32) / l
    att = att.transpose(0, 2, 1, 3).reshape(B, T, C)
    x2 = x + (jnp.matmul(att.astype(jnp.bfloat16), p["wo_bf"],
                         preferred_element_type=jnp.float32) + p["bo"])

    z = ln(x2, p["g2"], p["b2"])
    h = jnp.matmul(z.astype(jnp.bfloat16), p["wfc_bf"],
                   preferred_element_type=jnp.float32) + p["bfc"]
    h = 0.5 * h * (1.0 + jnp.tanh(GELU_C * (h + 0.044715 * h * h * h)))
    mlp = jnp.matmul(h.astype(jnp.bfloat16), p["wp2_bf"],
                     preferred_element_type=jnp.float32)
    return y + mlp


if __name__ == "__main__":
    batch, seq, n_embd, n_head = 2, 16, 64, 4      # small GPT-style config

    key = jax.random.PRNGKey(0)
    kx, kp = jax.random.split(key)
    x = jax.random.normal(kx, (batch, seq, n_embd), jnp.float32)
    params = prepare_params(init_params(kp, n_embd), n_head)

    out = vanilla_block_forward(x, params, n_head=n_head)
    jax.block_until_ready(out)

    expected = ref_vanilla_block(x, params, n_head=n_head)
    assert out.shape == (batch, seq, n_embd)
    assert jnp.allclose(out, expected, atol=5e-3, rtol=5e-3), (
        "max abs diff = %f" % float(jnp.max(jnp.abs(out - expected))))

    print("KERNEL_OK")
</pallas_src>

<mosaic_0001>
module attributes {stable_mosaic.version = 11 : i64} {
  func.func @vanilla_block_kernel(%arg0: i32, %arg1: memref<1x16x64xf32, #tpu.memory_space<vmem>>, %arg2: memref<1x64xf32, #tpu.memory_space<vmem>>, %arg3: memref<1x64xf32, #tpu.memory_space<vmem>>, %arg4: memref<4x64x16xbf16, #tpu.memory_space<vmem>>, %arg5: memref<4x64x16xbf16, #tpu.memory_space<vmem>>, %arg6: memref<4x64x16xbf16, #tpu.memory_space<vmem>>, %arg7: memref<4x16x64xbf16, #tpu.memory_space<vmem>>, %arg8: memref<1x64xf32, #tpu.memory_space<vmem>>, %arg9: memref<1x64xf32, #tpu.memory_space<vmem>>, %arg10: memref<1x64xf32, #tpu.memory_space<vmem>>, %arg11: memref<64x256xbf16, #tpu.memory_space<vmem>>, %arg12: memref<1x256xf32, #tpu.memory_space<vmem>>, %arg13: memref<256x64xbf16, #tpu.memory_space<vmem>>, %arg14: memref<1x16x64xf32, #tpu.memory_space<vmem>>) attributes {dimension_semantics = [#tpu.dimension_semantics<parallel>], iteration_bounds = array<i64: 2>, scalar_prefetch = 0 : i64, scratch_operands = 0 : i64, tpu.core_type = #tpu.core_type<tc>, window_params = [{transform_indices = @transform_0, window_bounds = array<i64: 1, 16, 64>}, {pipeline_mode = #tpu.pipeline_mode<synchronous>, transform_indices = @transform_1, window_bounds = array<i64: 1, 64>}, {pipeline_mode = #tpu.pipeline_mode<synchronous>, transform_indices = @transform_2, window_bounds = array<i64: 1, 64>}, {pipeline_mode = #tpu.pipeline_mode<synchronous>, transform_indices = @transform_3, window_bounds = array<i64: 4, 64, 16>}, {pipeline_mode = #tpu.pipeline_mode<synchronous>, transform_indices = @transform_4, window_bounds = array<i64: 4, 64, 16>}, {pipeline_mode = #tpu.pipeline_mode<synchronous>, transform_indices = @transform_5, window_bounds = array<i64: 4, 64, 16>}, {pipeline_mode = #tpu.pipeline_mode<synchronous>, transform_indices = @transform_6, window_bounds = array<i64: 4, 16, 64>}, {pipeline_mode = #tpu.pipeline_mode<synchronous>, transform_indices = @transform_7, window_bounds = array<i64: 1, 64>}, {pipeline_mode = #tpu.pipeline_mode<synchronous>, transform_indices = @transform_8, window_bounds = array<i64: 1, 64>}, {pipeline_mode = #tpu.pipeline_mode<synchronous>, transform_indices = @transform_9, window_bounds = array<i64: 1, 64>}, {pipeline_mode = #tpu.pipeline_mode<synchronous>, transform_indices = @transform_10, window_bounds = array<i64: 64, 256>}, {pipeline_mode = #tpu.pipeline_mode<synchronous>, transform_indices = @transform_11, window_bounds = array<i64: 1, 256>}, {pipeline_mode = #tpu.pipeline_mode<synchronous>, transform_indices = @transform_12, window_bounds = array<i64: 256, 64>}, {transform_indices = @transform_13, window_bounds = array<i64: 1, 16, 64>}]} {
    %c0 = arith.constant 0 : index
    %c0_0 = arith.constant 0 : index
    %c0_1 = arith.constant 0 : index
    %0 = vector.load %arg1[%c0, %c0_0, %c0_1] : memref<1x16x64xf32, #tpu.memory_space<vmem>>, vector<1x16x64xf32>
    %1 = vector.shape_cast %0 : vector<1x16x64xf32> to vector<16x64xf32>
    %cst = arith.constant dense<0.000000e+00> : vector<16xf32>
    %2 = vector.multi_reduction <add>, %1, %cst [1] : vector<16x64xf32> to vector<16xf32>
    %3 = vector.shape_cast %2 : vector<16xf32> to vector<16x1xf32>
    %cst_2 = arith.constant 6.400000e+01 : f32
    %4 = vector.broadcast %cst_2 : f32 to vector<16x1xf32>
    %5 = arith.divf %3, %4 : vector<16x1xf32>
    %6 = vector.broadcast %5 : vector<16x1xf32> to vector<16x64xf32>
    %7 = arith.subf %1, %6 : vector<16x64xf32>
    %8 = arith.mulf %7, %7 : vector<16x64xf32>
    %cst_3 = arith.constant dense<0.000000e+00> : vector<16xf32>
    %9 = vector.multi_reduction <add>, %8, %cst_3 [1] : vector<16x64xf32> to vector<16xf32>
    %10 = vector.shape_cast %9 : vector<16xf32> to vector<16x1xf32>
    %cst_4 = arith.constant 6.400000e+01 : f32
    %11 = vector.broadcast %cst_4 : f32 to vector<16x1xf32>
    %12 = arith.divf %10, %11 : vector<16x1xf32>
    %cst_5 = arith.constant 9.99999974E-6 : f32
    %13 = vector.broadcast %cst_5 : f32 to vector<16x1xf32>
    %14 = arith.addf %12, %13 : vector<16x1xf32>
    %15 = math.rsqrt %14 : vector<16x1xf32>
    %16 = vector.broadcast %15 : vector<16x1xf32> to vector<16x64xf32>
    %17 = arith.mulf %7, %16 : vector<16x64xf32>
    %c0_6 = arith.constant 0 : index
    %c0_7 = arith.constant 0 : index
    %18 = vector.load %arg2[%c0_6, %c0_7] : memref<1x64xf32, #tpu.memory_space<vmem>>, vector<1x64xf32>
    %19 = vector.broadcast %18 : vector<1x64xf32> to vector<16x64xf32>
    %20 = arith.mulf %17, %19 : vector<16x64xf32>
    %c0_8 = arith.constant 0 : index
    %c0_9 = arith.constant 0 : index
    %21 = vector.load %arg3[%c0_8, %c0_9] : memref<1x64xf32, #tpu.memory_space<vmem>>, vector<1x64xf32>
    %22 = vector.broadcast %21 : vector<1x64xf32> to vector<16x64xf32>
    %23 = arith.addf %20, %22 : vector<16x64xf32>
    %24 = arith.truncf %23 : vector<16x64xf32> to vector<16x64xbf16>
    %25 = tpu.iota {dimensions = array<i32: 0>} : vector<16x16xi32>
    %26 = tpu.iota {dimensions = array<i32: 1>} : vector<16x16xi32>
    %27 = arith.cmpi sge, %25, %26 : vector<16x16xi32>
    %cst_10 = arith.constant 0.000000e+00 : f32
    %28 = vector.broadcast %cst_10 : f32 to vector<16x64xf32>
    %c0_11 = arith.constant 0 : index
    %c0_12 = arith.constant 0 : index
    %c0_13 = arith.constant 0 : index
    %29 = vector.load %arg4[%c0_11, %c0_12, %c0_13] : memref<4x64x16xbf16, #tpu.memory_space<vmem>>, vector<1x64x16xbf16>
    %30 = vector.shape_cast %29 : vector<1x64x16xbf16> to vector<64x16xbf16>
    %cst_14 = arith.constant dense<0.000000e+00> : vector<16x16xf32>
    %31 = tpu.matmul %24, %30, %cst_14 {dimension_numbers = #tpu.dot_dimension_numbers<[1], [0], [0], [1], [0, 0, 1, 1], [], []>} : vector<16x64xbf16>, vector<64x16xbf16>, vector<16x16xf32> -> vector<16x16xf32>
    %c0_15 = arith.constant 0 : index
    %c0_16 = arith.constant 0 : index
    %c0_17 = arith.constant 0 : index
    %32 = vector.load %arg5[%c0_15, %c0_16, %c0_17] : memref<4x64x16xbf16, #tpu.memory_space<vmem>>, vector<1x64x16xbf16>
    %33 = vector.shape_cast %32 : vector<1x64x16xbf16> to vector<64x16xbf16>
    %cst_18 = arith.constant dense<0.000000e+00> : vector<16x16xf32>
    %34 = tpu.matmul %24, %33, %cst_18 {dimension_numbers = #tpu.dot_dimension_numbers<[1], [0], [0], [1], [0, 0, 1, 1], [], []>} : vector<16x64xbf16>, vector<64x16xbf16>, vector<16x16xf32> -> vector<16x16xf32>
    %c0_19 = arith.constant 0 : index
    %c0_20 = arith.constant 0 : index
    %c0_21 = arith.constant 0 : index
    %35 = vector.load %arg6[%c0_19, %c0_20, %c0_21] : memref<4x64x16xbf16, #tpu.memory_space<vmem>>, vector<1x64x16xbf16>
    %36 = vector.shape_cast %35 : vector<1x64x16xbf16> to vector<64x16xbf16>
    %cst_22 = arith.constant dense<0.000000e+00> : vector<16x16xf32>
    %37 = tpu.matmul %24, %36, %cst_22 {dimension_numbers = #tpu.dot_dimension_numbers<[1], [0], [0], [1], [0, 0, 1, 1], [], []>} : vector<16x64xbf16>, vector<64x16xbf16>, vector<16x16xf32> -> vector<16x16xf32>
    %cst_23 = arith.constant 2.500000e-01 : f32
    %38 = vector.broadcast %cst_23 : f32 to vector<16x16xf32>
    %39 = arith.mulf %34, %38 : vector<16x16xf32>
    %40 = arith.truncf %39 : vector<16x16xf32> to vector<16x16xbf16>
    %41 = arith.truncf %31 : vector<16x16xf32> to vector<16x16xbf16>
    %cst_24 = arith.constant dense<0.000000e+00> : vector<16x16xf32>
    %42 = tpu.matmul %40, %41, %cst_24 {dimension_numbers = #tpu.dot_dimension_numbers<[1], [1], [0], [0], [0, 0, 1, 0], [], []>} : vector<16x16xbf16>, vector<16x16xbf16>, vector<16x16xf32> -> vector<16x16xf32>
    %cst_25 = arith.constant -1.000000e+30 : f32
    %43 = vector.broadcast %cst_25 : f32 to vector<16x16xf32>
    %44 = arith.select %27, %42, %43 : vector<16x16xi1>, vector<16x16xf32>
    %cst_26 = arith.constant dense<0xFF800000> : vector<16xf32>
    %45 = vector.multi_reduction <maximumf>, %44, %cst_26 [1] : vector<16x16xf32> to vector<16xf32>
    %46 = vector.shape_cast %45 : vector<16xf32> to vector<16x1xf32>
    %47 = vector.broadcast %46 : vector<16x1xf32> to vector<16x16xf32>
    %48 = arith.subf %44, %47 : vector<16x16xf32>
    %49 = math.exp %48 : vector<16x16xf32>
    %cst_27 = arith.constant dense<0.000000e+00> : vector<16xf32>
    %50 = vector.multi_reduction <add>, %49, %cst_27 [1] : vector<16x16xf32> to vector<16xf32>
    %51 = vector.shape_cast %50 : vector<16xf32> to vector<16x1xf32>
    %52 = arith.truncf %49 : vector<16x16xf32> to vector<16x16xbf16>
    %53 = arith.truncf %37 : vector<16x16xf32> to vector<16x16xbf16>
    %cst_28 = arith.constant dense<0.000000e+00> : vector<16x16xf32>
    %54 = tpu.matmul %52, %53, %cst_28 {dimension_numbers = #tpu.dot_dimension_numbers<[1], [0], [0], [1], [0, 0, 1, 1], [], []>} : vector<16x16xbf16>, vector<16x16xbf16>, vector<16x16xf32> -> vector<16x16xf32>
    %cst_29 = arith.constant 1.000000e+00 : f32
    %55 = vector.broadcast %cst_29 : f32 to vector<16x1xf32>
    %56 = arith.divf %55, %51 : vector<16x1xf32>
    %57 = vector.broadcast %56 : vector<16x1xf32> to vector<16x16xf32>
    %58 = arith.mulf %54, %57 : vector<16x16xf32>
    %59 = arith.truncf %58 : vector<16x16xf32> to vector<16x16xbf16>
    %c0_30 = arith.constant 0 : index
    %c0_31 = arith.constant 0 : index
    %c0_32 = arith.constant 0 : index
    %60 = vector.load %arg7[%c0_30, %c0_31, %c0_32] : memref<4x16x64xbf16, #tpu.memory_space<vmem>>, vector<1x16x64xbf16>
    %61 = vector.shape_cast %60 : vector<1x16x64xbf16> to vector<16x64xbf16>
    %cst_33 = arith.constant dense<0.000000e+00> : vector<16x64xf32>
    %62 = tpu.matmul %59, %61, %cst_33 {dimension_numbers = #tpu.dot_dimension_numbers<[1], [0], [0], [1], [0, 0, 1, 1], [], []>} : vector<16x16xbf16>, vector<16x64xbf16>, vector<16x64xf32> -> vector<16x64xf32>
    %63 = arith.addf %28, %62 : vector<16x64xf32>
    %c1 = arith.constant 1 : index
    %c0_34 = arith.constant 0 : index
    %c0_35 = arith.constant 0 : index
    %64 = vector.load %arg4[%c1, %c0_34, %c0_35] : memref<4x64x16xbf16, #tpu.memory_space<vmem>>, vector<1x64x16xbf16>
    %65 = vector.shape_cast %64 : vector<1x64x16xbf16> to vector<64x16xbf16>
    %cst_36 = arith.constant dense<0.000000e+00> : vector<16x16xf32>
    %66 = tpu.matmul %24, %65, %cst_36 {dimension_numbers = #tpu.dot_dimension_numbers<[1], [0], [0], [1], [0, 0, 1, 1], [], []>} : vector<16x64xbf16>, vector<64x16xbf16>, vector<16x16xf32> -> vector<16x16xf32>
    %c1_37 = arith.constant 1 : index
    %c0_38 = arith.constant 0 : index
    %c0_39 = arith.constant 0 : index
    %67 = vector.load %arg5[%c1_37, %c0_38, %c0_39] : memref<4x64x16xbf16, #tpu.memory_space<vmem>>, vector<1x64x16xbf16>
    %68 = vector.shape_cast %67 : vector<1x64x16xbf16> to vector<64x16xbf16>
    %cst_40 = arith.constant dense<0.000000e+00> : vector<16x16xf32>
    %69 = tpu.matmul %24, %68, %cst_40 {dimension_numbers = #tpu.dot_dimension_numbers<[1], [0], [0], [1], [0, 0, 1, 1], [], []>} : vector<16x64xbf16>, vector<64x16xbf16>, vector<16x16xf32> -> vector<16x16xf32>
    %c1_41 = arith.constant 1 : index
    %c0_42 = arith.constant 0 : index
    %c0_43 = arith.constant 0 : index
    %70 = vector.load %arg6[%c1_41, %c0_42, %c0_43] : memref<4x64x16xbf16, #tpu.memory_space<vmem>>, vector<1x64x16xbf16>
    %71 = vector.shape_cast %70 : vector<1x64x16xbf16> to vector<64x16xbf16>
    %cst_44 = arith.constant dense<0.000000e+00> : vector<16x16xf32>
    %72 = tpu.matmul %24, %71, %cst_44 {dimension_numbers = #tpu.dot_dimension_numbers<[1], [0], [0], [1], [0, 0, 1, 1], [], []>} : vector<16x64xbf16>, vector<64x16xbf16>, vector<16x16xf32> -> vector<16x16xf32>
    %cst_45 = arith.constant 2.500000e-01 : f32
    %73 = vector.broadcast %cst_45 : f32 to vector<16x16xf32>
    %74 = arith.mulf %69, %73 : vector<16x16xf32>
    %75 = arith.truncf %74 : vector<16x16xf32> to vector<16x16xbf16>
    %76 = arith.truncf %66 : vector<16x16xf32> to vector<16x16xbf16>
    %cst_46 = arith.constant dense<0.000000e+00> : vector<16x16xf32>
    %77 = tpu.matmul %75, %76, %cst_46 {dimension_numbers = #tpu.dot_dimension_numbers<[1], [1], [0], [0], [0, 0, 1, 0], [], []>} : vector<16x16xbf16>, vector<16x16xbf16>, vector<16x16xf32> -> vector<16x16xf32>
    %cst_47 = arith.constant -1.000000e+30 : f32
    %78 = vector.broadcast %cst_47 : f32 to vector<16x16xf32>
    %79 = arith.select %27, %77, %78 : vector<16x16xi1>, vector<16x16xf32>
    %cst_48 = arith.constant dense<0xFF800000> : vector<16xf32>
    %80 = vector.multi_reduction <maximumf>, %79, %cst_48 [1] : vector<16x16xf32> to vector<16xf32>
    %81 = vector.shape_cast %80 : vector<16xf32> to vector<16x1xf32>
    %82 = vector.broadcast %81 : vector<16x1xf32> to vector<16x16xf32>
    %83 = arith.subf %79, %82 : vector<16x16xf32>
    %84 = math.exp %83 : vector<16x16xf32>
    %cst_49 = arith.constant dense<0.000000e+00> : vector<16xf32>
    %85 = vector.multi_reduction <add>, %84, %cst_49 [1] : vector<16x16xf32> to vector<16xf32>
    %86 = vector.shape_cast %85 : vector<16xf32> to vector<16x1xf32>
    %87 = arith.truncf %84 : vector<16x16xf32> to vector<16x16xbf16>
    %88 = arith.truncf %72 : vector<16x16xf32> to vector<16x16xbf16>
    %cst_50 = arith.constant dense<0.000000e+00> : vector<16x16xf32>
    %89 = tpu.matmul %87, %88, %cst_50 {dimension_numbers = #tpu.dot_dimension_numbers<[1], [0], [0], [1], [0, 0, 1, 1], [], []>} : vector<16x16xbf16>, vector<16x16xbf16>, vector<16x16xf32> -> vector<16x16xf32>
    %cst_51 = arith.constant 1.000000e+00 : f32
    %90 = vector.broadcast %cst_51 : f32 to vector<16x1xf32>
    %91 = arith.divf %90, %86 : vector<16x1xf32>
    %92 = vector.broadcast %91 : vector<16x1xf32> to vector<16x16xf32>
    %93 = arith.mulf %89, %92 : vector<16x16xf32>
    %94 = arith.truncf %93 : vector<16x16xf32> to vector<16x16xbf16>
    %c1_52 = arith.constant 1 : index
    %c0_53 = arith.constant 0 : index
    %c0_54 = arith.constant 0 : index
    %95 = vector.load %arg7[%c1_52, %c0_53, %c0_54] : memref<4x16x64xbf16, #tpu.memory_space<vmem>>, vector<1x16x64xbf16>
    %96 = vector.shape_cast %95 : vector<1x16x64xbf16> to vector<16x64xbf16>
    %cst_55 = arith.constant dense<0.000000e+00> : vector<16x64xf32>
    %97 = tpu.matmul %94, %96, %cst_55 {dimension_numbers = #tpu.dot_dimension_numbers<[1], [0], [0], [1], [0, 0, 1, 1], [], []>} : vector<16x16xbf16>, vector<16x64xbf16>, vector<16x64xf32> -> vector<16x64xf32>
    %98 = arith.addf %63, %97 : vector<16x64xf32>
    %c2 = arith.constant 2 : index
    %c0_56 = arith.constant 0 : index
    %c0_57 = arith.constant 0 : index
    %99 = vector.load %arg4[%c2, %c0_56, %c0_57] : memref<4x64x16xbf16, #tpu.memory_space<vmem>>, vector<1x64x16xbf16>
    %100 = vector.shape_cast %99 : vector<1x64x16xbf16> to vector<64x16xbf16>
    %cst_58 = arith.constant dense<0.000000e+00> : vector<16x16xf32>
    %101 = tpu.matmul %24, %100, %cst_58 {dimension_numbers = #tpu.dot_dimension_numbers<[1], [0], [0], [1], [0, 0, 1, 1], [], []>} : vector<16x64xbf16>, vector<64x16xbf16>, vector<16x16xf32> -> vector<16x16xf32>
    %c2_59 = arith.constant 2 : index
    %c0_60 = arith.constant 0 : index
    %c0_61 = arith.constant 0 : index
    %102 = vector.load %arg5[%c2_59, %c0_60, %c0_61] : memref<4x64x16xbf16, #tpu.memory_space<vmem>>, vector<1x64x16xbf16>
    %103 = vector.shape_cast %102 : vector<1x64x16xbf16> to vector<64x16xbf16>
    %cst_62 = arith.constant dense<0.000000e+00> : vector<16x16xf32>
    %104 = tpu.matmul %24, %103, %cst_62 {dimension_numbers = #tpu.dot_dimension_numbers<[1], [0], [0], [1], [0, 0, 1, 1], [], []>} : vector<16x64xbf16>, vector<64x16xbf16>, vector<16x16xf32> -> vector<16x16xf32>
    %c2_63 = arith.constant 2 : index
    %c0_64 = arith.constant 0 : index
    %c0_65 = arith.constant 0 : index
    %105 = vector.load %arg6[%c2_63, %c0_64, %c0_65] : memref<4x64x16xbf16, #tpu.memory_space<vmem>>, vector<1x64x16xbf16>
    %106 = vector.shape_cast %105 : vector<1x64x16xbf16> to vector<64x16xbf16>
    %cst_66 = arith.constant dense<0.000000e+00> : vector<16x16xf32>
    %107 = tpu.matmul %24, %106, %cst_66 {dimension_numbers = #tpu.dot_dimension_numbers<[1], [0], [0], [1], [0, 0, 1, 1], [], []>} : vector<16x64xbf16>, vector<64x16xbf16>, vector<16x16xf32> -> vector<16x16xf32>
    %cst_67 = arith.constant 2.500000e-01 : f32
    %108 = vector.broadcast %cst_67 : f32 to vector<16x16xf32>
    %109 = arith.mulf %104, %108 : vector<16x16xf32>
    %110 = arith.truncf %109 : vector<16x16xf32> to vector<16x16xbf16>
    %111 = arith.truncf %101 : vector<16x16xf32> to vector<16x16xbf16>
    %cst_68 = arith.constant dense<0.000000e+00> : vector<16x16xf32>
    %112 = tpu.matmul %110, %111, %cst_68 {dimension_numbers = #tpu.dot_dimension_numbers<[1], [1], [0], [0], [0, 0, 1, 0], [], []>} : vector<16x16xbf16>, vector<16x16xbf16>, vector<16x16xf32> -> vector<16x16xf32>
    %cst_69 = arith.constant -1.000000e+30 : f32
    %113 = vector.broadcast %cst_69 : f32 to vector<16x16xf32>
    %114 = arith.select %27, %112, %113 : vector<16x16xi1>, vector<16x16xf32>
    %cst_70 = arith.constant dense<0xFF800000> : vector<16xf32>
    %115 = vector.multi_reduction <maximumf>, %114, %cst_70 [1] : vector<16x16xf32> to vector<16xf32>
    %116 = vector.shape_cast %115 : vector<16xf32> to vector<16x1xf32>
    %117 = vector.broadcast %116 : vector<16x1xf32> to vector<16x16xf32>
    %118 = arith.subf %114, %117 : vector<16x16xf32>
    %119 = math.exp %118 : vector<16x16xf32>
    %cst_71 = arith.constant dense<0.000000e+00> : vector<16xf32>
    %120 = vector.multi_reduction <add>, %119, %cst_71 [1] : vector<16x16xf32> to vector<16xf32>
    %121 = vector.shape_cast %120 : vector<16xf32> to vector<16x1xf32>
    %122 = arith.truncf %119 : vector<16x16xf32> to vector<16x16xbf16>
    %123 = arith.truncf %107 : vector<16x16xf32> to vector<16x16xbf16>
    %cst_72 = arith.constant dense<0.000000e+00> : vector<16x16xf32>
    %124 = tpu.matmul %122, %123, %cst_72 {dimension_numbers = #tpu.dot_dimension_numbers<[1], [0], [0], [1], [0, 0, 1, 1], [], []>} : vector<16x16xbf16>, vector<16x16xbf16>, vector<16x16xf32> -> vector<16x16xf32>
    %cst_73 = arith.constant 1.000000e+00 : f32
    %125 = vector.broadcast %cst_73 : f32 to vector<16x1xf32>
    %126 = arith.divf %125, %121 : vector<16x1xf32>
    %127 = vector.broadcast %126 : vector<16x1xf32> to vector<16x16xf32>
    %128 = arith.mulf %124, %127 : vector<16x16xf32>
    %129 = arith.truncf %128 : vector<16x16xf32> to vector<16x16xbf16>
    %c2_74 = arith.constant 2 : index
    %c0_75 = arith.constant 0 : index
    %c0_76 = arith.constant 0 : index
    %130 = vector.load %arg7[%c2_74, %c0_75, %c0_76] : memref<4x16x64xbf16, #tpu.memory_space<vmem>>, vector<1x16x64xbf16>
    %131 = vector.shape_cast %130 : vector<1x16x64xbf16> to vector<16x64xbf16>
    %cst_77 = arith.constant dense<0.000000e+00> : vector<16x64xf32>
    %132 = tpu.matmul %129, %131, %cst_77 {dimension_numbers = #tpu.dot_dimension_numbers<[1], [0], [0], [1], [0, 0, 1, 1], [], []>} : vector<16x16xbf16>, vector<16x64xbf16>, vector<16x64xf32> -> vector<16x64xf32>
    %133 = arith.addf %98, %132 : vector<16x64xf32>
    %c3 = arith.constant 3 : index
    %c0_78 = arith.constant 0 : index
    %c0_79 = arith.constant 0 : index
    %134 = vector.load %arg4[%c3, %c0_78, %c0_79] : memref<4x64x16xbf16, #tpu.memory_space<vmem>>, vector<1x64x16xbf16>
    %135 = vector.shape_cast %134 : vector<1x64x16xbf16> to vector<64x16xbf16>
    %cst_80 = arith.constant dense<0.000000e+00> : vector<16x16xf32>
    %136 = tpu.matmul %24, %135, %cst_80 {dimension_numbers = #tpu.dot_dimension_numbers<[1], [0], [0], [1], [0, 0, 1, 1], [], []>} : vector<16x64xbf16>, vector<64x16xbf16>, vector<16x16xf32> -> vector<16x16xf32>
    %c3_81 = arith.constant 3 : index
    %c0_82 = arith.constant 0 : index
    %c0_83 = arith.constant 0 : index
    %137 = vector.load %arg5[%c3_81, %c0_82, %c0_83] : memref<4x64x16xbf16, #tpu.memory_space<vmem>>, vector<1x64x16xbf16>
    %138 = vector.shape_cast %137 : vector<1x64x16xbf16> to vector<64x16xbf16>
    %cst_84 = arith.constant dense<0.000000e+00> : vector<16x16xf32>
    %139 = tpu.matmul %24, %138, %cst_84 {dimension_numbers = #tpu.dot_dimension_numbers<[1], [0], [0], [1], [0, 0, 1, 1], [], []>} : vector<16x64xbf16>, vector<64x16xbf16>, vector<16x16xf32> -> vector<16x16xf32>
    %c3_85 = arith.constant 3 : index
    %c0_86 = arith.constant 0 : index
    %c0_87 = arith.constant 0 : index
    %140 = vector.load %arg6[%c3_85, %c0_86, %c0_87] : memref<4x64x16xbf16, #tpu.memory_space<vmem>>, vector<1x64x16xbf16>
    %141 = vector.shape_cast %140 : vector<1x64x16xbf16> to vector<64x16xbf16>
    %cst_88 = arith.constant dense<0.000000e+00> : vector<16x16xf32>
    %142 = tpu.matmul %24, %141, %cst_88 {dimension_numbers = #tpu.dot_dimension_numbers<[1], [0], [0], [1], [0, 0, 1, 1], [], []>} : vector<16x64xbf16>, vector<64x16xbf16>, vector<16x16xf32> -> vector<16x16xf32>
    %cst_89 = arith.constant 2.500000e-01 : f32
    %143 = vector.broadcast %cst_89 : f32 to vector<16x16xf32>
    %144 = arith.mulf %139, %143 : vector<16x16xf32>
    %145 = arith.truncf %144 : vector<16x16xf32> to vector<16x16xbf16>
    %146 = arith.truncf %136 : vector<16x16xf32> to vector<16x16xbf16>
    %cst_90 = arith.constant dense<0.000000e+00> : vector<16x16xf32>
    %147 = tpu.matmul %145, %146, %cst_90 {dimension_numbers = #tpu.dot_dimension_numbers<[1], [1], [0], [0], [0, 0, 1, 0], [], []>} : vector<16x16xbf16>, vector<16x16xbf16>, vector<16x16xf32> -> vector<16x16xf32>
    %cst_91 = arith.constant -1.000000e+30 : f32
    %148 = vector.broadcast %cst_91 : f32 to vector<16x16xf32>
    %149 = arith.select %27, %147, %148 : vector<16x16xi1>, vector<16x16xf32>
    %cst_92 = arith.constant dense<0xFF800000> : vector<16xf32>
    %150 = vector.multi_reduction <maximumf>, %149, %cst_92 [1] : vector<16x16xf32> to vector<16xf32>
    %151 = vector.shape_cast %150 : vector<16xf32> to vector<16x1xf32>
    %152 = vector.broadcast %151 : vector<16x1xf32> to vector<16x16xf32>
    %153 = arith.subf %149, %152 : vector<16x16xf32>
    %154 = math.exp %153 : vector<16x16xf32>
    %cst_93 = arith.constant dense<0.000000e+00> : vector<16xf32>
    %155 = vector.multi_reduction <add>, %154, %cst_93 [1] : vector<16x16xf32> to vector<16xf32>
    %156 = vector.shape_cast %155 : vector<16xf32> to vector<16x1xf32>
    %157 = arith.truncf %154 : vector<16x16xf32> to vector<16x16xbf16>
    %158 = arith.truncf %142 : vector<16x16xf32> to vector<16x16xbf16>
    %cst_94 = arith.constant dense<0.000000e+00> : vector<16x16xf32>
    %159 = tpu.matmul %157, %158, %cst_94 {dimension_numbers = #tpu.dot_dimension_numbers<[1], [0], [0], [1], [0, 0, 1, 1], [], []>} : vector<16x16xbf16>, vector<16x16xbf16>, vector<16x16xf32> -> vector<16x16xf32>
    %cst_95 = arith.constant 1.000000e+00 : f32
    %160 = vector.broadcast %cst_95 : f32 to vector<16x1xf32>
    %161 = arith.divf %160, %156 : vector<16x1xf32>
    %162 = vector.broadcast %161 : vector<16x1xf32> to vector<16x16xf32>
    %163 = arith.mulf %159, %162 : vector<16x16xf32>
    %164 = arith.truncf %163 : vector<16x16xf32> to vector<16x16xbf16>
    %c3_96 = arith.constant 3 : index
    %c0_97 = arith.constant 0 : index
    %c0_98 = arith.constant 0 : index
    %165 = vector.load %arg7[%c3_96, %c0_97, %c0_98] : memref<4x16x64xbf16, #tpu.memory_space<vmem>>, vector<1x16x64xbf16>
    %166 = vector.shape_cast %165 : vector<1x16x64xbf16> to vector<16x64xbf16>
    %cst_99 = arith.constant dense<0.000000e+00> : vector<16x64xf32>
    %167 = tpu.matmul %164, %166, %cst_99 {dimension_numbers = #tpu.dot_dimension_numbers<[1], [0], [0], [1], [0, 0, 1, 1], [], []>} : vector<16x16xbf16>, vector<16x64xbf16>, vector<16x64xf32> -> vector<16x64xf32>
    %168 = arith.addf %133, %167 : vector<16x64xf32>
    %169 = arith.addf %1, %168 : vector<16x64xf32>
    %c0_100 = arith.constant 0 : index
    %c0_101 = arith.constant 0 : index
    %170 = vector.load %arg8[%c0_100, %c0_101] : memref<1x64xf32, #tpu.memory_space<vmem>>, vector<1x64xf32>
    %171 = vector.broadcast %170 : vector<1x64xf32> to vector<16x64xf32>
    %172 = arith.addf %169, %171 : vector<16x64xf32>
    %cst_102 = arith.constant dense<0.000000e+00> : vector<16xf32>
    %173 = vector.multi_reduction <add>, %172, %cst_102 [1] : vector<16x64xf32> to vector<16xf32>
    %174 = vector.shape_cast %173 : vector<16xf32> to vector<16x1xf32>
    %cst_103 = arith.constant 6.400000e+01 : f32
    %175 = vector.broadcast %cst_103 : f32 to vector<16x1xf32>
    %176 = arith.divf %174, %175 : vector<16x1xf32>
    %177 = vector.broadcast %176 : vector<16x1xf32> to vector<16x64xf32>
    %178 = arith.subf %172, %177 : vector<16x64xf32>
    %179 = arith.mulf %178, %178 : vector<16x64xf32>
    %cst_104 = arith.constant dense<0.000000e+00> : vector<16xf32>
    %180 = vector.multi_reduction <add>, %179, %cst_104 [1] : vector<16x64xf32> to vector<16xf32>
    %181 = vector.shape_cast %180 : vector<16xf32> to vector<16x1xf32>
    %cst_105 = arith.constant 6.400000e+01 : f32
    %182 = vector.broadcast %cst_105 : f32 to vector<16x1xf32>
    %183 = arith.divf %181, %182 : vector<16x1xf32>
    %cst_106 = arith.constant 9.99999974E-6 : f32
    %184 = vector.broadcast %cst_106 : f32 to vector<16x1xf32>
    %185 = arith.addf %183, %184 : vector<16x1xf32>
    %186 = math.rsqrt %185 : vector<16x1xf32>
    %187 = vector.broadcast %186 : vector<16x1xf32> to vector<16x64xf32>
    %188 = arith.mulf %178, %187 : vector<16x64xf32>
    %c0_107 = arith.constant 0 : index
    %c0_108 = arith.constant 0 : index
    %189 = vector.load %arg9[%c0_107, %c0_108] : memref<1x64xf32, #tpu.memory_space<vmem>>, vector<1x64xf32>
    %190 = vector.broadcast %189 : vector<1x64xf32> to vector<16x64xf32>
    %191 = arith.mulf %188, %190 : vector<16x64xf32>
    %c0_109 = arith.constant 0 : index
    %c0_110 = arith.constant 0 : index
    %192 = vector.load %arg10[%c0_109, %c0_110] : memref<1x64xf32, #tpu.memory_space<vmem>>, vector<1x64xf32>
    %193 = vector.broadcast %192 : vector<1x64xf32> to vector<16x64xf32>
    %194 = arith.addf %191, %193 : vector<16x64xf32>
    %195 = arith.truncf %194 : vector<16x64xf32> to vector<16x64xbf16>
    %c0_111 = arith.constant 0 : index
    %c0_112 = arith.constant 0 : index
    %196 = vector.load %arg11[%c0_111, %c0_112] : memref<64x256xbf16, #tpu.memory_space<vmem>>, vector<64x256xbf16>
    %cst_113 = arith.constant dense<0.000000e+00> : vector<16x256xf32>
    %197 = tpu.matmul %195, %196, %cst_113 {dimension_numbers = #tpu.dot_dimension_numbers<[1], [0], [0], [1], [0, 0, 1, 1], [], []>} : vector<16x64xbf16>, vector<64x256xbf16>, vector<16x256xf32> -> vector<16x256xf32>
    %c0_114 = arith.constant 0 : index
    %c0_115 = arith.constant 0 : index
    %198 = vector.load %arg12[%c0_114, %c0_115] : memref<1x256xf32, #tpu.memory_space<vmem>>, vector<1x256xf32>
    %199 = vector.broadcast %198 : vector<1x256xf32> to vector<16x256xf32>
    %200 = arith.addf %197, %199 : vector<16x256xf32>
    %cst_116 = arith.constant 5.000000e-01 : f32
    %201 = vector.broadcast %cst_116 : f32 to vector<16x256xf32>
    %202 = arith.mulf %201, %200 : vector<16x256xf32>
    %cst_117 = arith.constant 4.471500e-02 : f32
    %203 = vector.broadcast %cst_117 : f32 to vector<16x256xf32>
    %204 = arith.mulf %203, %200 : vector<16x256xf32>
    %205 = arith.mulf %204, %200 : vector<16x256xf32>
    %206 = arith.mulf %205, %200 : vector<16x256xf32>
    %207 = arith.addf %200, %206 : vector<16x256xf32>
    %cst_118 = arith.constant 0.797884583 : f32
    %208 = vector.broadcast %cst_118 : f32 to vector<16x256xf32>
    %209 = arith.mulf %208, %207 : vector<16x256xf32>
    %210 = math.tanh %209 : vector<16x256xf32>
    %cst_119 = arith.constant 1.000000e+00 : f32
    %211 = vector.broadcast %cst_119 : f32 to vector<16x256xf32>
    %212 = arith.addf %211, %210 : vector<16x256xf32>
    %213 = arith.mulf %202, %212 : vector<16x256xf32>
    %214 = arith.truncf %213 : vector<16x256xf32> to vector<16x256xbf16>
    %c0_120 = arith.constant 0 : index
    %c0_121 = arith.constant 0 : index
    %215 = vector.load %arg13[%c0_120, %c0_121] : memref<256x64xbf16, #tpu.memory_space<vmem>>, vector<256x64xbf16>
    %cst_122 = arith.constant dense<0.000000e+00> : vector<16x64xf32>
    %216 = tpu.matmul %214, %215, %cst_122 {dimension_numbers = #tpu.dot_dimension_numbers<[1], [0], [0], [1], [0, 0, 1, 1], [], []>} : vector<16x256xbf16>, vector<256x64xbf16>, vector<16x64xf32> -> vector<16x64xf32>
    %217 = arith.addf %23, %216 : vector<16x64xf32>
    %c0_123 = arith.constant 0 : index
    %c0_124 = arith.constant 0 : index
    %c0_125 = arith.constant 0 : index
    %218 = vector.load %arg14[%c0_123, %c0_124, %c0_125] : memref<1x16x64xf32, #tpu.memory_space<vmem>>, vector<1x16x64xf32>
    %219 = vector.shape_cast %218 : vector<1x16x64xf32> to vector<16x64xf32>
    %220 = vector.shape_cast %217 : vector<16x64xf32> to vector<1x16x64xf32>
    tpu.vector_store %arg14[%c0_123, %c0_124, %c0_125], %220 {strides = array<i32>} : memref<1x16x64xf32, #tpu.memory_space<vmem>>, vector<1x16x64xf32>,
    return
  }
  func.func @transform_0(%arg0: i32) -> (i32, i32, i32) {
    %c0_i32 = arith.constant 0 : i32
    %c0_i32_0 = arith.constant 0 : i32
    %c0_i32_1 = arith.constant 0 : i32
    return %arg0, %c0_i32, %c0_i32_0 : i32, i32, i32
  }
  func.func @transform_1(%arg0: i32) -> (i32, i32) {
    %c0_i32 = arith.constant 0 : i32
    %c0_i32_0 = arith.constant 0 : i32
    %c0_i32_1 = arith.constant 0 : i32
    return %c0_i32, %c0_i32_0 : i32, i32
  }
  func.func @transform_2(%arg0: i32) -> (i32, i32) {
    %c0_i32 = arith.constant 0 : i32
    %c0_i32_0 = arith.constant 0 : i32
    %c0_i32_1 = arith.constant 0 : i32
    return %c0_i32, %c0_i32_0 : i32, i32
  }
  func.func @transform_3(%arg0: i32) -> (i32, i32, i32) {
    %c0_i32 = arith.constant 0 : i32
    %c0_i32_0 = arith.constant 0 : i32
    %c0_i32_1 = arith.constant 0 : i32
    %c0_i32_2 = arith.constant 0 : i32
    return %c0_i32, %c0_i32_0, %c0_i32_1 : i32, i32, i32
  }
  func.func @transform_4(%arg0: i32) -> (i32, i32, i32) {
    %c0_i32 = arith.constant 0 : i32
    %c0_i32_0 = arith.constant 0 : i32
    %c0_i32_1 = arith.constant 0 : i32
    %c0_i32_2 = arith.constant 0 : i32
    return %c0_i32, %c0_i32_0, %c0_i32_1 : i32, i32, i32
  }
  func.func @transform_5(%arg0: i32) -> (i32, i32, i32) {
    %c0_i32 = arith.constant 0 : i32
    %c0_i32_0 = arith.constant 0 : i32
    %c0_i32_1 = arith.constant 0 : i32
    %c0_i32_2 = arith.constant 0 : i32
    return %c0_i32, %c0_i32_0, %c0_i32_1 : i32, i32, i32
  }
  func.func @transform_6(%arg0: i32) -> (i32, i32, i32) {
    %c0_i32 = arith.constant 0 : i32
    %c0_i32_0 = arith.constant 0 : i32
    %c0_i32_1 = arith.constant 0 : i32
    %c0_i32_2 = arith.constant 0 : i32
    return %c0_i32, %c0_i32_0, %c0_i32_1 : i32, i32, i32
  }
  func.func @transform_7(%arg0: i32) -> (i32, i32) {
    %c0_i32 = arith.constant 0 : i32
    %c0_i32_0 = arith.constant 0 : i32
    %c0_i32_1 = arith.constant 0 : i32
    return %c0_i32, %c0_i32_0 : i32, i32
  }
  func.func @transform_8(%arg0: i32) -> (i32, i32) {
    %c0_i32 = arith.constant 0 : i32
    %c0_i32_0 = arith.constant 0 : i32
    %c0_i32_1 = arith.constant 0 : i32
    return %c0_i32, %c0_i32_0 : i32, i32
  }
  func.func @transform_9(%arg0: i32) -> (i32, i32) {
    %c0_i32 = arith.constant 0 : i32
    %c0_i32_0 = arith.constant 0 : i32
    %c0_i32_1 = arith.constant 0 : i32
    return %c0_i32, %c0_i32_0 : i32, i32
  }
  func.func @transform_10(%arg0: i32) -> (i32, i32) {
    %c0_i32 = arith.constant 0 : i32
    %c0_i32_0 = arith.constant 0 : i32
    %c0_i32_1 = arith.constant 0 : i32
    return %c0_i32, %c0_i32_0 : i32, i32
  }
  func.func @transform_11(%arg0: i32) -> (i32, i32) {
    %c0_i32 = arith.constant 0 : i32
    %c0_i32_0 = arith.constant 0 : i32
    %c0_i32_1 = arith.constant 0 : i32
    return %c0_i32, %c0_i32_0 : i32, i32
  }
  func.func @transform_12(%arg0: i32) -> (i32, i32) {
    %c0_i32 = arith.constant 0 : i32
    %c0_i32_0 = arith.constant 0 : i32
    %c0_i32_1 = arith.constant 0 : i32
    return %c0_i32, %c0_i32_0 : i32, i32
  }
  func.func @transform_13(%arg0: i32) -> (i32, i32, i32) {
    %c0_i32 = arith.constant 0 : i32
    %c0_i32_0 = arith.constant 0 : i32
    %c0_i32_1 = arith.constant 0 : i32
    return %arg0, %c0_i32, %c0_i32_0 : i32, i32, i32
  }
}

</mosaic_0001>

<bundles_post_ra>
// kernel: tpu_custom_call.1
= control target key start
LH: loop header
LB: loop body
LE: loop exit
PB: predicated region body
PF: predicated region fallthrough
CT: control target
= control target key end

     0   :  { %s3963_s0 = inlined_call_operand.vmem [shape: f32[2,16,64], index: 0, kind: input, shape index: {}]   ;;  %s3964_s1 = inlined_call_operand.vmem [shape: f32[1,64], index: 1, kind: input, shape index: {}]   ;;  %s3965_s2 = inlined_call_operand.vmem [shape: f32[1,64], index: 2, kind: input, shape index: {}]   ;;  %s3966_s3 = inlined_call_operand.vmem [shape: bf16[4,64,16], index: 3, kind: input, shape index: {}]   ;;  %s3967_s4 = inlined_call_operand.vmem [shape: bf16[4,64,16], index: 4, kind: input, shape index: {}]   ;;  %s3968_s5 = inlined_call_operand.vmem [shape: bf16[4,64,16], index: 5, kind: input, shape index: {}]   ;;  %s3969_s6 = inlined_call_operand.vmem [shape: bf16[4,16,64], index: 6, kind: input, shape index: {}]   ;;  %s3970_s7 = inlined_call_operand.vmem [shape: f32[1,64], index: 7, kind: input, shape index: {}]   ;;  %s3971_s8 = inlined_call_operand.vmem [shape: f32[1,64], index: 8, kind: input, shape index: {}]   ;;  %s3972_s9 = inlined_call_operand.vmem [shape: f32[1,64], index: 9, kind: input, shape index: {}]   ;;  %s3973_s10 = inlined_call_operand.vmem [shape: bf16[64,256], index: 10, kind: input, shape index: {}]   ;;  %s3974_s11 = inlined_call_operand.vmem [shape: f32[1,256], index: 11, kind: input, shape index: {}]   ;;  %s3975_s12 = inlined_call_operand.vmem [shape: bf16[256,64], index: 12, kind: input, shape index: {}]   ;;  %s3976_s13 = inlined_call_operand.hbm [shape: f32[2,16,64], index: 13, kind: output, shape index: {}]  }
   0x1   :  { %3977 = sst [smem:[#allocation5_spill]] %s3963_s0 }
   0x2   :  { %3978 = sst [smem:[#allocation6_spill]] %s3964_s1 }
   0x3   :  { %3979 = sst [smem:[#allocation7_spill]] %s3965_s2 }
   0x4   :  { %18 = vsyncpa [#allocation3], 0 }
   0x5   :  { %20 = vsyncpa [#allocation3 + $0x1], 0  ;;  %s3377_s25 = smov 0   ;;  %s3379_s26 = smov 0  }
   0x6   :  { %s3381_s27 = smov 0   ;;  %s3383_s28 = smov 0  }
   0x7 LB: > { %s3398_s29 = sadd.s32 4294967295, %s3299_s28   ;;  %s2545_s30 = sadd.s32 4294967294, %s3299_s28   ;;  %s3299_s28 = sphi %s3383_s28, %s3988_s28   ;;  %s3295_s27 = sphi %s3381_s27, %s3987_s27   ;;  %s3291_s26 = sphi %s3379_s26, %s3986_s26   ;;  %s3287_s25 = sphi %s3377_s25, %s3985_s25  }
   0x8   : > { %s3402_s14 = sadd.s32 1, %s3299_s28   ;;  %s311_s15 = sadd.s32 1, %s3295_s27 }
   0x9   : > { %s308_s16 = ssub.s32 %s3299_s28, %s3402_s14  ;;  %p321_p0 = scmp.ne.s32.totalorder %s3295_s27, %s3291_s26 }
   0xa   : > { %p309_p1 = scmp.eq.s32.totalorder %s308_s16, 0  ;;  %p322_p2 = scmp.eq.s32.totalorder %s3398_s29, 1 }
   0xb   : > { %p327_p3 = scmp.ne.s32.totalorder %s3291_s26, %s3287_s25  ;;  %p328_p4 = scmp.eq.s32.totalorder %s2545_s30, 1 }
   0xc   : > { %s3413_s17 = scalar_select %p309_p1, %s3295_s27, %s311_s15  }
   0xd   : > { %p3415_p5 = por %p322_p2, %p321_p0  ;;  %p3419_p6 = por %p328_p4, %p327_p3 }
   0xe   : > { %p2548_p7 = scmp.ge.s32.totalorder %s3299_s28, 1  ;;  %p390_p8 = scmp.lt.s32.totalorder %s3299_s28, 3 }
  0x10   : > { %p391_p9 = pnand %p2548_p7, %p390_p8 }
  0x11   : > { %p434_p10 = scmp.lt.s32.totalorder (!%p391_p9), %s3398_s29, 1  ;;  %s3982_s0 = sld [smem:[#allocation5_spill]] (!%p391_p9) }
  0x12   : > { %394 = sbr.rel (%p391_p9) target bundleno = 4199 (0x1067), region = 72  ;;  %s3983_s1 = sld [smem:[#allocation6_spill]] (!%p391_p9) }
  0x13   : > { %s3984_s2 = sld [smem:[#allocation7_spill]] (!%p391_p9)  ;;  %s431_s15 = sand.u32 (!%p391_p9), 1, %s3291_s26  }
  0x14   : > { %s2549_s16 = sshll.u32 (!%p391_p9), %s431_s15, 4  ;;  %s3923_s30 = scalar_lea.sflag (!%p391_p9), [#allocation3], %s431_s15 }
  0x17   : > { %vm442_vm0 = vcmask 523264   ;;  %s435_s20 = scalar_select %p434_p10, %s3398_s29, 1  ;;  %v3109_v14 = vld [vmem:[%s3966_s3 + $0x18] sm:$0xff]   ;;  %v3301_v15 = vmov 0.0   ;;  %v3111_v17 = vld [vmem:[%s3966_s3 + $0x10] sm:$0xff]   ;;  %v3113_v19 = vld [vmem:[%s3966_s3 + $0x8] sm:$0xff]  }
  0x18   : > { %2849 = vmatprep.subr.bf16.mxu0 %v3301_v15  ;;  %2861 = vmatprep.subr.bf16.mxu1 %v3301_v15  ;;  %v3110_v16 = vld [vmem:[%s3967_s4 + $0x18] sm:$0xff]   ;;  %v3112_v18 = vld [vmem:[%s3967_s4 + $0x10] sm:$0xff]   ;;  %v3114_v20 = vld [vmem:[%s3967_s4 + $0x8] sm:$0xff]   ;;  %vm3302_vm1 = vmmov 0   ;;  %vm722_vm2 = vcmask 130048  }
  0x19   : > { %s2741_s21 = sshll.u32 %s435_s20, 4  ;;  %2850 = vmatpush3.bf16.msra.mxu0 %v3109_v14  ;;  %2862 = vmatpush3.bf16.msra.mxu1 %v3110_v16  ;;  %v3115_v21 = vld [vmem:[%s3966_s3] sm:$0xff]   ;;  %v3117_v39 = vld [vmem:[%s3968_s5 + $0x18] sm:$0xff]   ;;  %v3118_v41 = vld [vmem:[%s3968_s5 + $0x10] sm:$0xff]  }
  0x1a   : > { %s3430_s24 = scalar_lea.vmem %s3982_s0, %s2741_s21  ;;  %2851 = vmatprep.subr.bf16.mxu0 %v3301_v15  ;;  %2863 = vmatprep.subr.bf16.mxu1 %v3301_v15  ;;  %v3116_v22 = vld [vmem:[%s3967_s4] sm:$0xff]   ;;  %v3119_v42 = vld [vmem:[%s3968_s5 + $0x8] sm:$0xff]   ;;  %v3121_v56 = vld [vmem:[%s3966_s3 + $0x38] sm:$0xff]   ;;  %s2742_s21 = sshll.u32 %s3398_s29, 8 }
  0x1b   : > { %v440_v0 = vld [vmem:[%s3430_s24] sm:$0xff]  ;;  %v441_v1 = vld [vmem:[%s3430_s24 + $0x8] sm:$0xff]  ;;  %2857 = vmatprep.mubr.msk.bf16.mxu0 %vm3302_vm1, %v3301_v15  ;;  %2869 = vmatprep.mubr.msk.bf16.mxu1 %vm3302_vm1, %v3301_v15  ;;  %v3122_v59 = vld [vmem:[%s3966_s3 + $0x30] sm:$0xff]   ;;  %s3917_s23 = scalar_lea.hbm %s3976_s13, %s2742_s21  ;;  %s3304_s0 = smov [#allocation2]  }
  0x1c   : > { %v443_v2 = vsel %vm442_vm0, %v440_v0, 0.0  ;;  %v446_v3 = vsel %vm442_vm0, %v441_v1, 0.0  ;;  %v2552_v31 = vld [vmem:[%s3983_s1] ss:$0 sm:$0xff]  ;;  %v3123_v62 = vld [vmem:[%s3966_s3 + $0x28] sm:$0xff]   ;;  %s433_s1 = scalar_lea.vmem [#allocation2], %s2549_s16 }
  0x1d   : > { %444 = vadd.xlane.f32.xlu0 %v443_v2  ;;  %2852 = vmatpush3.bf16.msra.mxu0 %v3111_v17  ;;  %v2553_v35 = vld [vmem:[%s3984_s2] ss:$0 sm:$0xff]  ;;  %v3125_v2 = vld [vmem:[%s3968_s5 + $0x38] sm:$0xff]   ;;  %s2483_s20 = sshll.u32 %s433_s1, 4  ;;  %s3243_s16 = sshll.u32 %s3304_s0, 4  ;;  %s3919_s20 = int_to_ptr.vmem [resolvable:$true] %s2483_s20  ;;  %s3244_s16 = int_to_ptr.vmem [resolvable:$false] %s3243_s16 }
  0x1e   : > { %2864 = vmatpush3.bf16.msra.mxu1 %v3112_v18  ;;  %2853 = vmatprep.subr.bf16.mxu0 %v3301_v15  ;;  %v3120_v43 = vld [vmem:[%s3968_s5] sm:$0xff]   ;;  %s3239_s29 = scalar_lea.vmem %s3919_s20, 256  ;;  %s3245_s21 = scalar_lea.vmem %s3244_s16, 512 }
  0x1f   : > { %2865 = vmatprep.subr.bf16.mxu1 %v3301_v15  ;;  %p3240_p11 = scmp.ne.s32.totalorder %s3919_s20, %s3239_s29  ;;  %p3246_p0 = scmp.lt.s32.totalorder %s3919_s20, %s3244_s16 }
  0x20   : > { %p3247_p1 = scmp.lt.s32.totalorder %s3245_s21, %s3239_s29 }
  0x21   : > { %447 = vadd.xlane.f32.xlu0 %v446_v3  ;;  %2854 = vmatpush3.bf16.msra.mxu0 %v3113_v19  ;;  %v3126_v3 = vld [vmem:[%s3968_s5 + $0x30] sm:$0xff]   ;;  %p3241_p12 = pnand %p3240_p11, %p3415_p5 }
  0x22   : > { %2866 = vmatpush3.bf16.msra.mxu1 %v3114_v20  ;;  %2855 = vmatprep.subr.bf16.mxu0 %v3301_v15  ;;  %p3248_p2 = por %p3247_p1, %p3246_p0 }
  0x23   : > { %2867 = vmatprep.subr.bf16.mxu1 %v3301_v15  ;;  %p3242_p13 = pneg %p3241_p12 }
  0x25   : > { %2856 = vmatpush3.bf16.msra.mxu0 %v3115_v21  ;;  %p3249_p3 = pnand %p3248_p2, %p3242_p13 }
  0x26   : > { %2868 = vmatpush3.bf16.msra.mxu1 %v3116_v22  ;;  %2873 = vmatprep.subr.bf16.mxu0 %v3301_v15 }
  0x27   : > { %2891 = vmatprep.subr.bf16.mxu1 %v3301_v15 }
  0xa6   : > { %v445_v4 = vpop.xlane.xlu0 %444 }
  0xa7   : > { %v450_v5 = vmul.f32 0.015625, %v445_v4  ;;  %v3127_v4 = vld [vmem:[%s3968_s5 + $0x28] sm:$0xff]  }
  0xa9   : > { %v452_v6 = vsub.f32 %v440_v0, %v450_v5  ;;  %v3128_v5 = vld [vmem:[%s3968_s5 + $0x20] sm:$0xff]  }
  0xaa   : > { %v448_v7 = vpop.xlane.xlu0 %447 }
  0xab   : > { %v451_v8 = vmul.f32 0.015625, %v448_v7  ;;  %v454_v9 = vmul.f32 %v452_v6, %v452_v6 }
  0xad   : > { %v453_v10 = vsub.f32 %v441_v1, %v451_v8  ;;  %v456_v11 = vsel %vm442_vm0, %v454_v9, 0.0  ;;  %v3124_v1 = vld [vmem:[%s3966_s3 + $0x20] sm:$0xff]  }
  0xae   : > { %457 = vadd.xlane.f32.xlu1 %v456_v11 }
  0xaf   : > { %v455_v12 = vmul.f32 %v453_v10, %v453_v10 }
  0xb1   : > { %v459_v13 = vsel %vm442_vm0, %v455_v12, 0.0 }
  0xb2   : > { %460 = vadd.xlane.f32.xlu1 %v459_v13 }
 0x137   : > { %v458_v23 = vpop.xlane.xlu1 %457 }
 0x138   : > { %v462_v24 = vmul.f32 0.015625, %v458_v23 }
 0x13a   : > { %v464_v25 = vadd.f32 1e-05, %v462_v24 }
 0x13b   : > { %v461_v26 = vpop.xlane.xlu1 %460 }
 0x13c   : > { %3189 = vrsqrt.f32 %v464_v25  ;;  %v463_v27 = vmul.f32 0.015625, %v461_v26 }
 0x13e   : > { %v465_v28 = vadd.f32 1e-05, %v463_v27 }
 0x140   : > { %3191 = vrsqrt.f32 %v465_v28 }
 0x149   : > { %v3190_v29 = vpop.eup %3189 }
 0x14a   : > { %v468_v30 = vmul.f32 %v3190_v29, %v452_v6  ;;  %v489_v6 = vlaneseq }
 0x14c   : > { %v477_v33 = vmul.f32 %v2552_v31, %v468_v30  ;;  %v3564_v7 = vshrl.u32 %v489_v6, 7  ;;  %v3566_v8 = vand.u32 127, %v489_v6 }
 0x14d   : > { %v3192_v32 = vpop.eup %3191 }
 0x14e   : > { %v469_v34 = vmul.f32 %v3192_v32, %v453_v10  ;;  %v3482_v37 = vadd.f32 %v2553_v35, %v477_v33  ;;  %vm494_vm3 = vcmp.ge.s32.totalorder %v3564_v7, %v3566_v8  ;;  %v3571_v9 = vadd.s32 8, %v3564_v7 }
 0x150   : > { %v478_v36 = vmul.f32 %v2552_v31, %v469_v34  ;;  %vm495_vm4 = vcmp.ge.s32.totalorder %v3571_v9, %v3566_v8 }
 0x152   : > { %v3484_v38 = vadd.f32 %v2553_v35, %v478_v36 }
 0x154   : > { %v3491_v40 = vpack.c.bf16 %v3484_v38, %v3482_v37 }
 0x156   : > { %2858 = vmatmul.mubr.msk.bf16.vlgmr.msra.gmra.mxu0 %vm442_vm0, %v3491_v40  ;;  %2870 = vmatmul.mubr.msk.bf16.vlgmr.msra.gmra.mxu1 %vm442_vm0, %v3491_v40 }
 0x157   : > { %2874 = vmatpush3.bf16.msra.mxu0 %v3117_v39  ;;  %2881 = vmatprep.mubr.msk.bf16.mxu0 %vm3302_vm1, %v3301_v15  ;;  %v3129_v39 = vld [vmem:[%s3967_s4 + $0x38] sm:$0xff]  }
 0x158   : > { %2875 = vmatprep.subr.bf16.mxu0 %v3301_v15  ;;  %2893 = vmatprep.mubr.msk.bf16.mxu1 %vm3302_vm1, %v3301_v15 }
 0x15b   : > { %2876 = vmatpush3.bf16.msra.mxu0 %v3118_v41 }
 0x15c   : > { %2877 = vmatprep.subr.bf16.mxu0 %v3301_v15 }
 0x15f   : > { %2878 = vmatpush3.bf16.msra.mxu0 %v3119_v42  ;;  %v3130_v42 = vld [vmem:[%s3967_s4 + $0x30] sm:$0xff]  }
 0x160   : > { %2879 = vmatprep.subr.bf16.mxu0 %v3301_v15 }
 0x163   : > { %2880 = vmatpush3.bf16.msra.mxu0 %v3120_v43  ;;  %v3131_v43 = vld [vmem:[%s3967_s4 + $0x28] sm:$0xff]  }
 0x164   : > { %2885 = vmatprep.subr.bf16.mxu0 %v3301_v15 }
 0x166   : > { %2882 = vmatmul.mubr.msk.bf16.vlgmr.msra.gmra.mxu0 %vm442_vm0, %v3491_v40 }
 0x167   : > { %2887 = vmatprep.mubr.msk.bf16.mxu0 %vm3302_vm1, %v3301_v15 }
 0x216   : > { %v565_v44 = vpop.f32.mrf.mxu0  ;;  %v638_v45 = vpop.f32.mrf.mxu1 }
 0x217   : > { %v718_v55 = vmul.f32 0.25, %v638_v45 }
 0x218   : > { %v2859_v46 = vpop.f32.mrf.mxu0  ;;  %v2871_v47 = vpop.f32.mrf.mxu1 }
 0x21a   : > { %v568_v48 = vpop.f32.mrf.mxu0  ;;  %v641_v49 = vpop.f32.mrf.mxu1 }
 0x21b   : > { %v721_v50 = vpack.c.bf16 %v568_v48, %v565_v44  ;;  %v719_v54 = vmul.f32 0.25, %v641_v49  ;;  %v3132_v44 = vld [vmem:[%s3967_s4 + $0x20] sm:$0xff]  }
 0x21c   : > { %v2860_v51 = vpop.f32.mrf.mxu0  ;;  %v2872_v52 = vpop.f32.mrf.mxu1 }
 0x21d   : > { %v727_v53 = vsel %vm722_vm2, %v721_v50, 0  ;;  %v720_v57 = vpack.c.bf16 %v719_v54, %v718_v55 }
 0x21e   : > { %2886 = vmatpush3.bf16.xpose.msra.mxu0 %v727_v53 }
 0x21f   : > { %2897 = vmatprep.subr.bf16.mxu0 %v3301_v15 }
 0x225   : > { %2888 = vmatmul.mubr.msk.bf16.vlgmr.msra.gmra.mxu0 %vm722_vm2, %v720_v57 }
 0x226   : > { %v711_v58 = vpop.f32.mrf.mxu0  ;;  %2898 = vmatpush3.bf16.msra.mxu0 %v3121_v56  ;;  %2905 = vmatprep.mubr.msk.bf16.mxu0 %vm3302_vm1, %v3301_v15 }
 0x227   : > { %2899 = vmatprep.subr.bf16.mxu0 %v3301_v15 }
 0x228   : > { %v2883_v60 = vpop.f32.mrf.mxu0 }
 0x22a   : > { %v714_v61 = vpop.f32.mrf.mxu0  ;;  %2900 = vmatpush3.bf16.msra.mxu0 %v3122_v59 }
 0x22b   : > { %v791_v63 = vpack.c.bf16 %v714_v61, %v711_v58  ;;  %2901 = vmatprep.subr.bf16.mxu0 %v3301_v15 }
 0x22c   : > { %v2884_v0 = vpop.f32.mrf.mxu0 }
 0x22d   : > { %2892 = vmatpush3.bf16.msra.mxu1 %v791_v63 }
 0x22e   : > { %2902 = vmatpush3.bf16.msra.mxu0 %v3123_v62  ;;  %2909 = vmatprep.subr.bf16.mxu1 %v3301_v15 }
 0x22f   : > { %2903 = vmatprep.subr.bf16.mxu0 %v3301_v15 }
 0x232   : > { %2904 = vmatpush3.bf16.msra.mxu0 %v3124_v1 }
 0x233   : > { %2921 = vmatprep.subr.bf16.mxu0 %v3301_v15 }
 0x235   : > { %2906 = vmatmul.mubr.msk.bf16.vlgmr.msra.gmra.mxu0 %vm442_vm0, %v3491_v40 }
 0x236   : > { %2922 = vmatpush3.bf16.msra.mxu0 %v3125_v2  ;;  %2929 = vmatprep.mubr.msk.bf16.mxu0 %vm3302_vm1, %v3301_v15 }
 0x237   : > { %2923 = vmatprep.subr.bf16.mxu0 %v3301_v15 }
 0x23a   : > { %2924 = vmatpush3.bf16.msra.mxu0 %v3126_v3 }
 0x23b   : > { %2925 = vmatprep.subr.bf16.mxu0 %v3301_v15 }
 0x23e   : > { %2926 = vmatpush3.bf16.msra.mxu0 %v3127_v4 }
 0x23f   : > { %2927 = vmatprep.subr.bf16.mxu0 %v3301_v15 }
 0x242   : > { %2928 = vmatpush3.bf16.msra.mxu0 %v3128_v5 }
 0x243   : > { %2945 = vmatprep.subr.bf16.mxu0 %v3301_v15 }
 0x245   : > { %2930 = vmatmul.mubr.msk.bf16.vlgmr.msra.gmra.mxu0 %vm442_vm0, %v3491_v40 }
 0x246   : > { %2947 = vmatprep.mubr.msk.bf16.mxu0 %vm3302_vm1, %v3301_v15 }
 0x2e5   : > { %v763_v10 = vpop.f32.mrf.mxu0 }
 0x2e6   : > { %v770_v11 = vsel %vm494_vm3, %v763_v10, -1e+30 }
 0x2e7   : > { %v2889_v12 = vpop.f32.mrf.mxu0  ;;  %v772_v13 = vsel %vm722_vm2, %v770_v11, -inf }
 0x2e8   : > { %773 = vmax.xlane.f32.xlu0 %v772_v13 }
 0x2e9   : > { %v766_v14 = vpop.f32.mrf.mxu0 }
 0x2ea   : > { %v771_v16 = vsel %vm495_vm4, %v766_v14, -1e+30 }
 0x2eb   : > { %v2890_v17 = vpop.f32.mrf.mxu0  ;;  %v775_v18 = vsel %vm722_vm2, %v771_v16, -inf }
 0x2ec   : > { %776 = vmax.xlane.f32.xlu1 %v775_v18  ;;  %v3133_v18 = vld [vmem:[%s3969_s6] sm:$0xff]  }
 0x2f5   : > { %v912_v19 = vpop.f32.mrf.mxu0 }
 0x2f7   : > { %v2907_v20 = vpop.f32.mrf.mxu0 }
 0x2f9   : > { %v915_v21 = vpop.f32.mrf.mxu0 }
 0x2fa   : > { %v1070_v22 = vpack.c.bf16 %v915_v21, %v912_v19  ;;  %v3138_v19 = vld [vmem:[%s3969_s6 + $0x8] sm:$0xff]  }
 0x2fb   : > { %v2908_v23 = vpop.f32.mrf.mxu0  ;;  %2946 = vmatpush3.bf16.msra.mxu0 %v3138_v19 }
 0x2fc   : > { %v1075_v45 = vsel %vm722_vm2, %v1070_v22, 0  ;;  %2957 = vmatprep.subr.bf16.mxu0 %v3301_v15 }
 0x305   : > { %v1060_v24 = vpop.f32.mrf.mxu0 }
 0x307   : > { %v2931_v25 = vpop.f32.mrf.mxu0 }
 0x309   : > { %v1063_v26 = vpop.f32.mrf.mxu0 }
 0x30a   : > { %v1139_v27 = vpack.c.bf16 %v1063_v26, %v1060_v24 }
 0x30b   : > { %v2932_v28 = vpop.f32.mrf.mxu0 }
 0x30c   : > { %v3134_v28 = vld [vmem:[%s3967_s4 + $0x58] sm:$0xff]  }
 0x371   : > { %v774_v29 = vpop.xlane.xlu0 %773 }
 0x372   : > { %v778_v30 = vsub.f32 %v770_v11, %v774_v29 }
 0x374   : > { %v780_v31 = vmul.f32 1.442695, %v778_v30  ;;  %v3135_v30 = vld [vmem:[%s3967_s4 + $0x50] sm:$0xff]  }
 0x375   : > { %v777_v32 = vpop.xlane.xlu1 %776 }
 0x376   : > { %v779_v33 = vsub.f32 %v771_v16, %v777_v32  ;;  %3193 = vpow2.f32 %v780_v31  ;;  %v3136_v31 = vld [vmem:[%s3967_s4 + $0x48] sm:$0xff]   ;;  %v3137_v32 = vld [vmem:[%s3967_s4 + $0x40] sm:$0xff]  }
 0x378   : > { %v782_v34 = vmul.f32 1.442695, %v779_v33 }
 0x37a   : > { %3195 = vpow2.f32 %v782_v34 }
 0x383   : > { %v3194_v35 = vpop.eup %3193 }
 0x384   : > { %v784_v13 = vsel %vm722_vm2, %v3194_v35, 0.0 }
 0x387   : > { %v3583_v36 = vpop.eup %3195 }
 0x388   : > { %v790_v41 = vpack.c.bf16 %v3583_v36, %v3194_v35  ;;  %v787_v17 = vsel %vm722_vm2, %v3583_v36, 0.0 }
 0x38a   : > { %2894 = vmatmul.mubr.msk.bf16.vlgmr.msra.gmra.mxu1 %vm722_vm2, %v790_v41 }
 0x38b   : > { %2910 = vmatpush3.bf16.msra.mxu1 %v3129_v39  ;;  %2917 = vmatprep.mubr.msk.bf16.mxu1 %vm3302_vm1, %v3301_v15 }
 0x38c   : > { %2911 = vmatprep.subr.bf16.mxu1 %v3301_v15 }
 0x38f   : > { %2912 = vmatpush3.bf16.msra.mxu1 %v3130_v42 }
 0x390   : > { %2913 = vmatprep.subr.bf16.mxu1 %v3301_v15 }
 0x393   : > { %2914 = vmatpush3.bf16.msra.mxu1 %v3131_v43 }
 0x394   : > { %2915 = vmatprep.subr.bf16.mxu1 %v3301_v15 }
 0x397   : > { %2916 = vmatpush3.bf16.msra.mxu1 %v3132_v44  ;;  %v3139_v44 = vld [vmem:[%s3966_s3 + $0x58] sm:$0xff]  }
 0x398   : > { %2933 = vmatprep.subr.bf16.mxu1 %v3301_v15 }
 0x39a   : > { %2918 = vmatmul.mubr.msk.bf16.vlgmr.msra.gmra.mxu1 %vm442_vm0, %v3491_v40 }
 0x39b   : > { %2934 = vmatpush3.bf16.xpose.msra.mxu1 %v1075_v45  ;;  %2935 = vmatprep.mubr.msk.bf16.mxu1 %vm3302_vm1, %v3301_v15 }
 0x39c   : > { %2939 = vmatprep.subr.bf16.mxu1 %v3301_v15 }
 0x44a   : > { %v829_v46 = vpop.f32.mrf.mxu1 }
 0x44c   : > { %v2895_v47 = vpop.f32.mrf.mxu1 }
 0x44d   : > { %v3141_v47 = vld [vmem:[%s3966_s3 + $0x48] sm:$0xff]  }
 0x44e   : > { %v832_v48 = vpop.f32.mrf.mxu1 }
 0x450   : > { %v2896_v49 = vpop.f32.mrf.mxu1 }
 0x451   : > { %v3143_v49 = vld [vmem:[%s3968_s5 + $0x58] sm:$0xff]  }
 0x45a   : > { %v986_v50 = vpop.f32.mrf.mxu1 }
 0x45b   : > { %v1067_v53 = vmul.f32 0.25, %v986_v50  ;;  %v3144_v50 = vld [vmem:[%s3968_s5 + $0x50] sm:$0xff]  }
 0x45c   : > { %v2919_v51 = vpop.f32.mrf.mxu1 }
 0x45d   : > { %v3145_v51 = vld [vmem:[%s3968_s5 + $0x48] sm:$0xff]  }
 0x45e   : > { %v989_v52 = vpop.f32.mrf.mxu1 }
 0x45f   : > { %v1068_v54 = vmul.f32 0.25, %v989_v52  ;;  %v3146_v52 = vld [vmem:[%s3968_s5 + $0x40] sm:$0xff]  }
 0x460   : > { %v2920_v55 = vpop.f32.mrf.mxu1 }
 0x461   : > { %v1069_v56 = vpack.c.bf16 %v1068_v54, %v1067_v53 }
 0x463   : > { %2936 = vmatmul.mubr.msk.bf16.vlgmr.msra.gmra.mxu1 %vm722_vm2, %v1069_v56 }
 0x464   : > { %2940 = vmatpush3.bf16.msra.mxu1 %v1139_v27  ;;  %2941 = vmatprep.mubr.msk.bf16.mxu1 %vm3302_vm1, %v3301_v15 }
 0x465   : > { %2951 = vmatprep.subr.bf16.mxu1 %v3301_v15 }
 0x523   : > { %v1111_v57 = vpop.f32.mrf.mxu1 }
 0x524   : > { %v1118_v58 = vsel %vm494_vm3, %v1111_v57, -1e+30 }
 0x525   : > { %v2937_v59 = vpop.f32.mrf.mxu1  ;;  %v1120_v60 = vsel %vm722_vm2, %v1118_v58, -inf }
 0x526   : > { %1121 = vmax.xlane.f32.xlu0 %v1120_v60 }
 0x527   : > { %v1114_v61 = vpop.f32.mrf.mxu1 }
 0x528   : > { %v1119_v62 = vsel %vm495_vm4, %v1114_v61, -1e+30 }
 0x529   : > { %v2938_v63 = vpop.f32.mrf.mxu1  ;;  %v1123_v0 = vsel %vm722_vm2, %v1119_v62, -inf }
 0x52a   : > { %1124 = vmax.xlane.f32.xlu1 %v1123_v0 }
 0x5af   : > { %v1122_v1 = vpop.xlane.xlu0 %1121 }
 0x5b0   : > { %v1126_v2 = vsub.f32 %v1118_v58, %v1122_v1 }
 0x5b2   : > { %v1128_v3 = vmul.f32 1.442695, %v1126_v2 }
 0x5b3   : > { %v1125_v4 = vpop.xlane.xlu1 %1124 }
 0x5b4   : > { %3197 = vpow2.f32 %v1128_v3  ;;  %v1127_v5 = vsub.f32 %v1119_v62, %v1125_v4 }
 0x5b6   : > { %v1130_v6 = vmul.f32 1.442695, %v1127_v5 }
 0x5b8   : > { %3199 = vpow2.f32 %v1130_v6 }
 0x5c1   : > { %v3198_v10 = vpop.eup %3197 }
 0x5c2   : > { %v1132_v11 = vsel %vm722_vm2, %v3198_v10, 0.0 }
 0x5c3   : > { %1133 = vadd.xlane.f32.xlu0 %v1132_v11 }
 0x5c5   : > { %v3200_v12 = vpop.eup %3199 }
 0x5c6   : > { %v1135_v14 = vsel %vm722_vm2, %v3200_v12, 0.0  ;;  %v1138_v16 = vpack.c.bf16 %v3200_v12, %v3198_v10 }
 0x5c7   : > { %785 = vadd.xlane.f32.xlu0 %v784_v13  ;;  %1136 = vadd.xlane.f32.xlu1 %v1135_v14 }
 0x5c8   : > { %2942 = vmatmul.mubr.msk.bf16.vlgmr.msra.gmra.mxu1 %vm722_vm2, %v1138_v16 }
 0x5c9   : > { %2953 = vmatprep.mubr.msk.bf16.mxu1 %vm3302_vm1, %v3301_v15  ;;  %2952 = vmatpush3.bf16.msra.mxu1 %v3133_v18 }
 0x5ca   : > { %2969 = vmatprep.subr.bf16.mxu1 %v3301_v15 }
 0x5cb   : > { %788 = vadd.xlane.f32.xlu1 %v787_v17 }
 0x64c   : > { %v1134_v20 = vpop.xlane.xlu0 %1133 }
 0x650   : > { %v786_v21 = vpop.xlane.xlu0 %785  ;;  %v1137_v22 = vpop.xlane.xlu1 %1136 }
 0x651   : > { %3201 = vrcp.f32 %v786_v21 }
 0x654   : > { %v789_v23 = vpop.xlane.xlu1 %788 }
 0x655   : > { %3203 = vrcp.f32 %v789_v23 }
 0x656   : > { %3205 = vrcp.f32 %v1134_v20 }
 0x657   : > { %3207 = vrcp.f32 %v1137_v22 }
 0x65e   : > { %v3202_v24 = vpop.eup %3201 }
 0x65f   : > { %v840_v26 = vmul.f32 %v3202_v24, %v829_v46  ;;  %v3140_v46 = vld [vmem:[%s3966_s3 + $0x50] sm:$0xff]  }
 0x662   : > { %v3204_v25 = vpop.eup %3203 }
 0x663   : > { %v841_v27 = vmul.f32 %v3204_v25, %v832_v48  ;;  %v3206_v35 = vpop.eup %3205  ;;  %v3142_v48 = vld [vmem:[%s3966_s3 + $0x40] sm:$0xff]  }
 0x664   : > { %v3208_v36 = vpop.eup %3207 }
 0x665   : > { %v842_v29 = vpack.c.bf16 %v841_v27, %v840_v26 }
 0x667   : > { %2954 = vmatmul.mubr.msk.bf16.vlgmr.msra.gmra.mxu1 %vm722_vm2, %v842_v29 }
 0x668   : > { %2970 = vmatpush3.bf16.msra.mxu1 %v3134_v28  ;;  %2977 = vmatprep.mubr.msk.bf16.mxu1 %vm3302_vm1, %v3301_v15 }
 0x669   : > { %2971 = vmatprep.subr.bf16.mxu1 %v3301_v15 }
 0x66c   : > { %2972 = vmatpush3.bf16.msra.mxu1 %v3135_v30 }
 0x66d   : > { %2973 = vmatprep.subr.bf16.mxu1 %v3301_v15 }
 0x670   : > { %2974 = vmatpush3.bf16.msra.mxu1 %v3136_v31 }
 0x671   : > { %2975 = vmatprep.subr.bf16.mxu1 %v3301_v15 }
 0x674   : > { %2976 = vmatpush3.bf16.msra.mxu1 %v3137_v32 }
 0x675   : > { %2993 = vmatprep.subr.bf16.mxu1 %v3301_v15 }
 0x677   : > { %2978 = vmatmul.mubr.msk.bf16.vlgmr.msra.gmra.mxu1 %vm442_vm0, %v3491_v40 }
 0x678   : > { %2995 = vmatprep.mubr.msk.bf16.mxu1 %vm3302_vm1, %v3301_v15 }
 0x688   : > { %v1177_v33 = vpop.f32.mrf.mxu1 }
 0x689   : > { %v1188_v41 = vmul.f32 %v3206_v35, %v1177_v33 }
 0x68a   : > { %v2943_v34 = vpop.f32.mrf.mxu1 }
 0x68c   : > { %v1180_v39 = vpop.f32.mrf.mxu1 }
 0x68d   : > { %v1189_v42 = vmul.f32 %v3208_v36, %v1180_v39 }
 0x68e   : > { %v2944_v43 = vpop.f32.mrf.mxu1 }
 0x68f   : > { %v1190_v45 = vpack.c.bf16 %v1189_v42, %v1188_v41  ;;  %v3147_v41 = vld [vmem:[%s3966_s3 + $0x78] sm:$0xff]  }
 0x691   : > { %2948 = vmatmul.mubr.msk.bf16.vlgmr.msra.gmra.mxu0 %vm722_vm2, %v1190_v45  ;;  %v3149_v45 = vld [vmem:[%s3966_s3 + $0x68] sm:$0xff]  }
 0x692   : > { %2958 = vmatpush3.bf16.msra.mxu0 %v3139_v44  ;;  %2965 = vmatprep.mubr.msk.bf16.mxu0 %vm3302_vm1, %v3301_v15  ;;  %v3148_v44 = vld [vmem:[%s3966_s3 + $0x70] sm:$0xff]  }
 0x693   : > { %2959 = vmatprep.subr.bf16.mxu0 %v3301_v15 }
 0x696   : > { %2960 = vmatpush3.bf16.msra.mxu0 %v3140_v46  ;;  %v3150_v46 = vld [vmem:[%s3966_s3 + $0x60] sm:$0xff]  }
 0x697   : > { %2961 = vmatprep.subr.bf16.mxu0 %v3301_v15 }
 0x69a   : > { %2962 = vmatpush3.bf16.msra.mxu0 %v3141_v47  ;;  %v3151_v47 = vld [vmem:[%s3968_s5 + $0x78] sm:$0xff]  }
 0x69b   : > { %2963 = vmatprep.subr.bf16.mxu0 %v3301_v15 }
 0x69e   : > { %2964 = vmatpush3.bf16.msra.mxu0 %v3142_v48  ;;  %v3152_v48 = vld [vmem:[%s3968_s5 + $0x70] sm:$0xff]  }
 0x69f   : > { %2981 = vmatprep.subr.bf16.mxu0 %v3301_v15 }
 0x6a1   : > { %2966 = vmatmul.mubr.msk.bf16.vlgmr.msra.gmra.mxu0 %vm442_vm0, %v3491_v40 }
 0x6a2   : > { %2982 = vmatpush3.bf16.msra.mxu0 %v3143_v49  ;;  %2989 = vmatprep.mubr.msk.bf16.mxu0 %vm3302_vm1, %v3301_v15  ;;  %v3153_v49 = vld [vmem:[%s3968_s5 + $0x68] sm:$0xff]  }
 0x6a3   : > { %2983 = vmatprep.subr.bf16.mxu0 %v3301_v15 }
 0x6a6   : > { %2984 = vmatpush3.bf16.msra.mxu0 %v3144_v50  ;;  %v3154_v50 = vld [vmem:[%s3968_s5 + $0x60] sm:$0xff]  }
 0x6a7   : > { %2985 = vmatprep.subr.bf16.mxu0 %v3301_v15 }
 0x6aa   : > { %2986 = vmatpush3.bf16.msra.mxu0 %v3145_v51  ;;  %v3155_v51 = vld [vmem:[%s3969_s6 + $0x10] sm:$0xff]  }
 0x6ab   : > { %2987 = vmatprep.subr.bf16.mxu0 %v3301_v15 }
 0x6ae   : > { %2988 = vmatpush3.bf16.msra.mxu0 %v3146_v52 }
 0x6af   : > { %3005 = vmatprep.subr.bf16.mxu0 %v3301_v15 }
 0x6b1   : > { %2990 = vmatmul.mubr.msk.bf16.vlgmr.msra.gmra.mxu0 %vm442_vm0, %v3491_v40 }
 0x6b2   : > { %3007 = vmatprep.mubr.msk.bf16.mxu0 %vm3302_vm1, %v3301_v15  ;;  %3006 = vmatpush3.bf16.msra.mxu0 %v3155_v51 }
 0x6b3   : > { %3023 = vmatprep.subr.bf16.mxu0 %v3301_v15 }
 0x727   : > { %v1287_v53 = vpop.f32.mrf.mxu1 }
 0x729   : > { %v2955_v54 = vpop.f32.mrf.mxu1 }
 0x72b   : > { %v1290_v55 = vpop.f32.mrf.mxu1 }
 0x72d   : > { %v2956_v56 = vpop.f32.mrf.mxu1 }
 0x737   : > { %v1435_v57 = vpop.f32.mrf.mxu1 }
 0x738   : > { %v1516_v13 = vmul.f32 0.25, %v1435_v57 }
 0x739   : > { %v2979_v58 = vpop.f32.mrf.mxu1 }
 0x73b   : > { %v1438_v59 = vpop.f32.mrf.mxu1 }
 0x73c   : > { %v1517_v12 = vmul.f32 0.25, %v1438_v59 }
 0x73d   : > { %v2980_v60 = vpop.f32.mrf.mxu1 }
 0x73e   : > { %v1518_v14 = vpack.c.bf16 %v1517_v12, %v1516_v13 }
 0x751   : > { %v1237_v61 = vpop.f32.mrf.mxu0 }
 0x752   : > { %v3705_v62 = vadd.f32 %v1287_v53, %v1237_v61 }
 0x753   : > { %v2949_v63 = vpop.f32.mrf.mxu0 }
 0x754   : > { %v3156_v63 = vld [vmem:[%s3967_s4 + $0x78] sm:$0xff]  }
 0x755   : > { %v1240_v0 = vpop.f32.mrf.mxu0 }
 0x756   : > { %v3707_v1 = vadd.f32 %v1290_v55, %v1240_v0 }
 0x757   : > { %v2950_v2 = vpop.f32.mrf.mxu0 }
 0x758   : > { %v3157_v2 = vld [vmem:[%s3967_s4 + $0x70] sm:$0xff]  }
 0x761   : > { %v1361_v3 = vpop.f32.mrf.mxu0 }
 0x763   : > { %v2967_v4 = vpop.f32.mrf.mxu0 }
 0x765   : > { %v1364_v5 = vpop.f32.mrf.mxu0 }
 0x766   : > { %v1519_v6 = vpack.c.bf16 %v1364_v5, %v1361_v3  ;;  %v3158_v3 = vld [vmem:[%s3967_s4 + $0x68] sm:$0xff]  }
 0x767   : > { %v2968_v10 = vpop.f32.mrf.mxu0 }
 0x768   : > { %v1524_v11 = vsel %vm722_vm2, %v1519_v6, 0  ;;  %v3159_v6 = vld [vmem:[%s3967_s4 + $0x60] sm:$0xff]  }
 0x769   : > { %2994 = vmatpush3.bf16.xpose.msra.mxu1 %v1524_v11 }
 0x76a   : > { %2999 = vmatprep.subr.bf16.mxu1 %v3301_v15 }
 0x770   : > { %2996 = vmatmul.mubr.msk.bf16.vlgmr.msra.gmra.mxu1 %vm722_vm2, %v1518_v14 }
 0x771   : > { %v1509_v16 = vpop.f32.mrf.mxu0  ;;  %3001 = vmatprep.mubr.msk.bf16.mxu1 %vm3302_vm1, %v3301_v15 }
 0x773   : > { %v2991_v17 = vpop.f32.mrf.mxu0 }
 0x775   : > { %v1512_v18 = vpop.f32.mrf.mxu0 }
 0x776   : > { %v1588_v19 = vpack.c.bf16 %v1512_v18, %v1509_v16 }
 0x777   : > { %v2992_v20 = vpop.f32.mrf.mxu0 }
 0x778   : > { %3000 = vmatpush3.bf16.msra.mxu1 %v1588_v19 }
 0x779   : > { %3011 = vmatprep.subr.bf16.mxu1 %v3301_v15 }
 0x830   : > { %v1560_v21 = vpop.f32.mrf.mxu1 }
 0x831   : > { %v1567_v22 = vsel %vm494_vm3, %v1560_v21, -1e+30 }
 0x832   : > { %v2997_v23 = vpop.f32.mrf.mxu1  ;;  %v1569_v24 = vsel %vm722_vm2, %v1567_v22, -inf }
 0x833   : > { %1570 = vmax.xlane.f32.xlu0 %v1569_v24 }
 0x834   : > { %v1563_v25 = vpop.f32.mrf.mxu1 }
 0x835   : > { %v1568_v26 = vsel %vm495_vm4, %v1563_v25, -1e+30 }
 0x836   : > { %v2998_v27 = vpop.f32.mrf.mxu1  ;;  %v1572_v28 = vsel %vm722_vm2, %v1568_v26, -inf }
 0x837   : > { %1573 = vmax.xlane.f32.xlu1 %v1572_v28 }
 0x8bc   : > { %v1571_v29 = vpop.xlane.xlu0 %1570 }
 0x8bd   : > { %v1575_v30 = vsub.f32 %v1567_v22, %v1571_v29 }
 0x8bf   : > { %v1577_v31 = vmul.f32 1.442695, %v1575_v30 }
 0x8c0   : > { %v1574_v32 = vpop.xlane.xlu1 %1573 }
 0x8c1   : > { %3209 = vpow2.f32 %v1577_v31  ;;  %v1576_v33 = vsub.f32 %v1568_v26, %v1574_v32 }
 0x8c3   : > { %v1579_v34 = vmul.f32 1.442695, %v1576_v33 }
 0x8c5   : > { %3211 = vpow2.f32 %v1579_v34 }
 0x8ce   : > { %v3210_v35 = vpop.eup %3209 }
 0x8cf   : > { %v1581_v36 = vsel %vm722_vm2, %v3210_v35, 0.0 }
 0x8d0   : > { %1582 = vadd.xlane.f32.xlu0 %v1581_v36 }
 0x8d2   : > { %v3212_v39 = vpop.eup %3211 }
 0x8d3   : > { %v1584_v42 = vsel %vm722_vm2, %v3212_v39, 0.0  ;;  %v1587_v43 = vpack.c.bf16 %v3212_v39, %v3210_v35 }
 0x8d4   : > { %1585 = vadd.xlane.f32.xlu1 %v1584_v42 }
 0x8d5   : > { %3002 = vmatmul.mubr.msk.bf16.vlgmr.msra.gmra.mxu1 %vm722_vm2, %v1587_v43 }
 0x8d6   : > { %3012 = vmatpush3.bf16.msra.mxu1 %v3147_v41  ;;  %3019 = vmatprep.mubr.msk.bf16.mxu1 %vm3302_vm1, %v3301_v15 }
 0x8d7   : > { %3013 = vmatprep.subr.bf16.mxu1 %v3301_v15 }
 0x8da   : > { %3014 = vmatpush3.bf16.msra.mxu1 %v3148_v44 }
 0x8db   : > { %3015 = vmatprep.subr.bf16.mxu1 %v3301_v15 }
 0x8de   : > { %3016 = vmatpush3.bf16.msra.mxu1 %v3149_v45 }
 0x8df   : > { %3017 = vmatprep.subr.bf16.mxu1 %v3301_v15 }
 0x8e2   : > { %3018 = vmatpush3.bf16.msra.mxu1 %v3150_v46 }
 0x8e3   : > { %3035 = vmatprep.subr.bf16.mxu1 %v3301_v15 }
 0x8e5   : > { %3020 = vmatmul.mubr.msk.bf16.vlgmr.msra.gmra.mxu1 %vm442_vm0, %v3491_v40 }
 0x8e6   : > { %3036 = vmatpush3.bf16.msra.mxu1 %v3151_v47  ;;  %3043 = vmatprep.mubr.msk.bf16.mxu1 %vm3302_vm1, %v3301_v15 }
 0x8e7   : > { %3037 = vmatprep.subr.bf16.mxu1 %v3301_v15 }
 0x8ea   : > { %3038 = vmatpush3.bf16.msra.mxu1 %v3152_v48 }
 0x8eb   : > { %3039 = vmatprep.subr.bf16.mxu1 %v3301_v15 }
 0x8ee   : > { %3040 = vmatpush3.bf16.msra.mxu1 %v3153_v49  ;;  %v3160_v49 = vld [vmem:[%s3969_s6 + $0x18] sm:$0xff]  }
 0x8ef   : > { %3041 = vmatprep.subr.bf16.mxu1 %v3301_v15 }
 0x8f2   : > { %3042 = vmatpush3.bf16.msra.mxu1 %v3154_v50 }
 0x8f3   : > { %3059 = vmatprep.subr.bf16.mxu1 %v3301_v15 }
 0x8f5   : > { %3044 = vmatmul.mubr.msk.bf16.vlgmr.msra.gmra.mxu1 %vm442_vm0, %v3491_v40 }
 0x8f6   : > { %3061 = vmatprep.mubr.msk.bf16.mxu1 %vm3302_vm1, %v3301_v15  ;;  %3060 = vmatpush3.bf16.msra.mxu1 %v3160_v49 }
 0x959   : > { %v1583_v52 = vpop.xlane.xlu0 %1582 }
 0x95a   : > { %3213 = vrcp.f32 %v1583_v52 }
 0x95d   : > { %v1586_v53 = vpop.xlane.xlu1 %1585 }
 0x95e   : > { %3215 = vrcp.f32 %v1586_v53 }
 0x967   : > { %v3214_v56 = vpop.eup %3213 }
 0x96b   : > { %v3216_v57 = vpop.eup %3215 }
 0x995   : > { %v1626_v54 = vpop.f32.mrf.mxu1 }
 0x996   : > { %v1637_v59 = vmul.f32 %v3214_v56, %v1626_v54 }
 0x997   : > { %v3003_v55 = vpop.f32.mrf.mxu1 }
 0x999   : > { %v1629_v58 = vpop.f32.mrf.mxu1 }
 0x99a   : > { %v1638_v60 = vmul.f32 %v3216_v57, %v1629_v58 }
 0x99b   : > { %v3004_v61 = vpop.f32.mrf.mxu1 }
 0x99c   : > { %v1639_v0 = vpack.c.bf16 %v1638_v60, %v1637_v59 }
 0x99e   : > { %3008 = vmatmul.mubr.msk.bf16.vlgmr.msra.gmra.mxu0 %vm722_vm2, %v1639_v0 }
 0x99f   : > { %3024 = vmatpush3.bf16.msra.mxu0 %v3156_v63  ;;  %3031 = vmatprep.mubr.msk.bf16.mxu0 %vm3302_vm1, %v3301_v15 }
 0x9a0   : > { %3025 = vmatprep.subr.bf16.mxu0 %v3301_v15 }
 0x9a3   : > { %3026 = vmatpush3.bf16.msra.mxu0 %v3157_v2  ;;  %v2708_v2 = vld [vmem:[%s3970_s7] ss:$0 sm:$0xff] }
 0x9a4   : > { %3027 = vmatprep.subr.bf16.mxu0 %v3301_v15 }
 0x9a5   : > { %v1762_v4 = vpop.f32.mrf.mxu1 }
 0x9a7   : > { %v3021_v5 = vpop.f32.mrf.mxu1  ;;  %3028 = vmatpush3.bf16.msra.mxu0 %v3158_v3  ;;  %v3237_v3 = vld [vmem:[%s3430_s24] sm:$0xff] }
 0x9a8   : > { %3029 = vmatprep.subr.bf16.mxu0 %v3301_v15 }
 0x9a9   : > { %v1765_v10 = vpop.f32.mrf.mxu1 }
 0x9aa   : > { %v1920_v11 = vpack.c.bf16 %v1765_v10, %v1762_v4 }
 0x9ab   : > { %v3022_v12 = vpop.f32.mrf.mxu1  ;;  %3030 = vmatpush3.bf16.msra.mxu0 %v3159_v6 }
 0x9ac   : > { %3047 = vmatprep.subr.bf16.mxu0 %v3301_v15  ;;  %v1925_v13 = vsel %vm722_vm2, %v1920_v11, 0  ;;  %v3238_v12 = vld [vmem:[%s3430_s24 + $0x8] sm:$0xff] }
 0x9ae   : > { %3032 = vmatmul.mubr.msk.bf16.vlgmr.msra.gmra.mxu0 %vm442_vm0, %v3491_v40 }
 0x9af   : > { %3048 = vmatpush3.bf16.xpose.msra.mxu0 %v1925_v13  ;;  %3049 = vmatprep.mubr.msk.bf16.mxu0 %vm3302_vm1, %v3301_v15 }
 0x9b0   : > { %3053 = vmatprep.subr.bf16.mxu0 %v3301_v15 }
 0x9b5   : > { %v1910_v14 = vpop.f32.mrf.mxu1 }
 0x9b7   : > { %v3045_v16 = vpop.f32.mrf.mxu1 }
 0x9b9   : > { %v1913_v17 = vpop.f32.mrf.mxu1 }
 0x9ba   : > { %v1989_v18 = vpack.c.bf16 %v1913_v17, %v1910_v14 }
 0x9bb   : > { %v3046_v19 = vpop.f32.mrf.mxu1 }
 0xa5e   : > { %v1686_v20 = vpop.f32.mrf.mxu0 }
 0xa5f   : > { %v1693_v21 = vadd.f32 %v1686_v20, %v3705_v62 }
 0xa60   : > { %v3009_v22 = vpop.f32.mrf.mxu0 }
 0xa62   : > { %v1689_v23 = vpop.f32.mrf.mxu0 }
 0xa63   : > { %v1694_v24 = vadd.f32 %v1689_v23, %v3707_v1 }
 0xa64   : > { %v3010_v25 = vpop.f32.mrf.mxu0 }
 0xa6e   : > { %v1836_v40 = vpop.f32.mrf.mxu0 }
 0xa6f   : > { %v1917_v28 = vmul.f32 0.25, %v1836_v40 }
 0xa70   : > { %v3033_v26 = vpop.f32.mrf.mxu0 }
 0xa72   : > { %v1839_v27 = vpop.f32.mrf.mxu0 }
 0xa73   : > { %v1918_v29 = vmul.f32 0.25, %v1839_v27  ;;  %v3163_v27 = vld [vmem:[%s3973_s10 + $0x34] ss:$8 sps:$4 sm:$0xff]  }
 0xa74   : > { %v3034_v30 = vpop.f32.mrf.mxu0 }
 0xa75   : > { %v1919_v31 = vpack.c.bf16 %v1918_v29, %v1917_v28  ;;  %v3161_v28 = vld [vmem:[%s3973_s10 + $0x30] ss:$8 sps:$4 sm:$0xff]   ;;  %v3166_v29 = vld [vmem:[%s3973_s10 + $0x24] ss:$8 sps:$4 sm:$0xff]   ;;  %v3164_v30 = vld [vmem:[%s3973_s10 + $0x20] ss:$8 sps:$4 sm:$0xff]  }
 0xa77   : > { %3050 = vmatmul.mubr.msk.bf16.vlgmr.msra.gmra.mxu0 %vm722_vm2, %v1919_v31  ;;  %v3169_v31 = vld [vmem:[%s3973_s10 + $0x14] ss:$8 sps:$4 sm:$0xff]  }
 0xa78   : > { %3054 = vmatpush3.bf16.msra.mxu0 %v1989_v18  ;;  %3055 = vmatprep.mubr.msk.bf16.mxu0 %vm3302_vm1, %v3301_v15 }
 0xa79   : > { %2223 = vmatprep.subr.bf16.mxu0 %v3163_v27 }
 0xb37   : > { %v1961_v32 = vpop.f32.mrf.mxu0 }
 0xb38   : > { %v1968_v62 = vsel %vm494_vm3, %v1961_v32, -1e+30  ;;  %v3167_v32 = vld [vmem:[%s3973_s10 + $0x10] ss:$8 sps:$4 sm:$0xff]  }
 0xb39   : > { %v3051_v1 = vpop.f32.mrf.mxu0  ;;  %v1970_v33 = vsel %vm722_vm2, %v1968_v62, -inf }
 0xb3a   : > { %1971 = vmax.xlane.f32.xlu0 %v1970_v33  ;;  %v3170_v1 = vld [vmem:[%s3973_s10] ss:$8 sps:$4 sm:$0xff]   ;;  %v3303_v33 = vmov 0  }
 0xb3b   : > { %v1964_v34 = vpop.f32.mrf.mxu0 }
 0xb3c   : > { %v1969_v35 = vsel %vm495_vm4, %v1964_v34, -1e+30 }
 0xb3d   : > { %v3052_v36 = vpop.f32.mrf.mxu0  ;;  %v1973_v39 = vsel %vm722_vm2, %v1969_v35, -inf }
 0xb3e   : > { %1974 = vmax.xlane.f32.xlu1 %v1973_v39 }
 0xbc3   : > { %v1972_v41 = vpop.xlane.xlu0 %1971 }
 0xbc4   : > { %v1976_v15 = vsub.f32 %v1968_v62, %v1972_v41  ;;  %v3172_v62 = vld [vmem:[%s3973_s10 + $0x4] ss:$8 sps:$4 sm:$0xff]  }
 0xbc6   : > { %v1978_v42 = vmul.f32 1.442695, %v1976_v15 }
 0xbc7   : > { %v1975_v43 = vpop.xlane.xlu1 %1974 }
 0xbc8   : > { %3217 = vpow2.f32 %v1978_v42  ;;  %v1977_v44 = vsub.f32 %v1969_v35, %v1975_v43 }
 0xbca   : > { %v1980_v45 = vmul.f32 1.442695, %v1977_v44  ;;  %v2709_v44 = vld [vmem:[%s3971_s8] ss:$0 sm:$0xff] }
 0xbcc   : > { %3219 = vpow2.f32 %v1980_v45 }
 0xbd5   : > { %v3218_v46 = vpop.eup %3217 }
 0xbd6   : > { %v1982_v47 = vsel %vm722_vm2, %v3218_v46, 0.0 }
 0xbd7   : > { %1983 = vadd.xlane.f32.xlu0 %v1982_v47 }
 0xbd9   : > { %v3220_v48 = vpop.eup %3219 }
 0xbda   : > { %v1985_v8 = vsel %vm722_vm2, %v3220_v48, 0.0  ;;  %v1988_v9 = vpack.c.bf16 %v3220_v48, %v3218_v46  ;;  %v2710_v48 = vld [vmem:[%s3972_s9] ss:$0 sm:$0xff] }
 0xbdb   : > { %1986 = vadd.xlane.f32.xlu1 %v1985_v8 }
 0xbdc   : > { %3056 = vmatmul.mubr.msk.bf16.vlgmr.msra.gmra.mxu0 %vm722_vm2, %v1988_v9 }
 0xbdd   : > { %2224 = vmatpush1.bf16.msra.mxu0 %v3161_v28  ;;  %2247 = vmatprep.mubr.bf16.mxu0 %v3303_v33 }
 0xbde   : > { %2225 = vmatprep.subr.bf16.mxu0 %v3166_v29 }
 0xbe1   : > { %2226 = vmatpush1.bf16.msra.mxu0 %v3164_v30 }
 0xbe2   : > { %2227 = vmatprep.subr.bf16.mxu0 %v3169_v31 }
 0xbe5   : > { %2228 = vmatpush1.bf16.msra.mxu0 %v3167_v32 }
 0xbe6   : > { %2229 = vmatprep.subr.bf16.mxu0 %v3172_v62 }
 0xbe9   : > { %2230 = vmatpush1.bf16.msra.mxu0 %v3170_v1 }
 0xc60   : > { %v1984_v50 = vpop.xlane.xlu0 %1983 }
 0xc61   : > { %3221 = vrcp.f32 %v1984_v50 }
 0xc64   : > { %v1987_v51 = vpop.xlane.xlu1 %1986 }
 0xc65   : > { %3223 = vrcp.f32 %v1987_v51  ;;  %v3173_v51 = vld [vmem:[%s3975_s12 + $0x78] sm:$0xff]  }
 0xc66   : > { %2827 = vmatprep.subr.bf16.mxu1 %v3173_v51 }
 0xc6e   : > { %v3222_v54 = vpop.eup %3221 }
 0xc72   : > { %v3224_v55 = vpop.eup %3223 }
 0xc9c   : > { %v2027_v52 = vpop.f32.mrf.mxu0 }
 0xc9d   : > { %v2038_v57 = vmul.f32 %v3222_v54, %v2027_v52  ;;  %v3174_v52 = vld [vmem:[%s3975_s12 + $0x38] sm:$0xff]   ;;  %v3176_v54 = vld [vmem:[%s3975_s12 + $0x30] sm:$0xff]  }
 0xc9e   : > { %v3057_v53 = vpop.f32.mrf.mxu0 }
 0xc9f   : > { %v3175_v53 = vld [vmem:[%s3975_s12 + $0x70] sm:$0xff]  }
 0xca0   : > { %v2030_v56 = vpop.f32.mrf.mxu0 }
 0xca1   : > { %v2039_v58 = vmul.f32 %v3224_v55, %v2030_v56  ;;  %v3177_v55 = vld [vmem:[%s3975_s12 + $0x68] sm:$0xff]  }
 0xca2   : > { %v3058_v59 = vpop.f32.mrf.mxu0  ;;  %v3178_v56 = vld [vmem:[%s3975_s12 + $0x28] sm:$0xff]  }
 0xca3   : > { %v2040_v60 = vpack.c.bf16 %v2039_v58, %v2038_v57  ;;  %v3179_v57 = vld [vmem:[%s3975_s12 + $0x60] sm:$0xff]   ;;  %v3181_v59 = vld [vmem:[%s3975_s12 + $0x58] sm:$0xff]  }
 0xca4   : > { %v3180_v58 = vld [vmem:[%s3975_s12 + $0x20] sm:$0xff]  }
 0xca5   : > { %3062 = vmatmul.mubr.msk.bf16.vlgmr.msra.gmra.mxu1 %vm722_vm2, %v2040_v60  ;;  %v3182_v60 = vld [vmem:[%s3975_s12 + $0x18] sm:$0xff]  }
 0xca6   : > { %2828 = vmatpush3.bf16.msra.mxu1 %v3174_v52 }
 0xca7   : > { %2829 = vmatprep.subr.bf16.mxu1 %v3175_v53 }
 0xcaa   : > { %2830 = vmatpush3.bf16.msra.mxu1 %v3176_v54 }
 0xcab   : > { %2831 = vmatprep.subr.bf16.mxu1 %v3177_v55 }
 0xcae   : > { %2832 = vmatpush3.bf16.msra.mxu1 %v3178_v56 }
 0xcaf   : > { %2833 = vmatprep.subr.bf16.mxu1 %v3179_v57 }
 0xcb2   : > { %2834 = vmatpush3.bf16.msra.mxu1 %v3180_v58 }
 0xcb3   : > { %2835 = vmatprep.subr.bf16.mxu1 %v3181_v59 }
 0xcb6   : > { %2836 = vmatpush3.bf16.msra.mxu1 %v3182_v60 }
 0xd65   : > { %v2087_v61 = vpop.f32.mrf.mxu1 }
 0xd66   : > { %v2094_v63 = vadd.f32 %v2087_v61, %v1693_v21  ;;  %v3183_v61 = vld [vmem:[%s3975_s12 + $0x50] sm:$0xff]  }
 0xd67   : > { %v3063_v0 = vpop.f32.mrf.mxu1  ;;  %2837 = vmatprep.subr.bf16.mxu1 %v3183_v61 }
 0xd68   : > { %v2096_v4 = vadd.f32 %v3237_v3, %v2094_v63  ;;  %v3184_v63 = vld [vmem:[%s3975_s12 + $0x10] sm:$0xff]   ;;  %v3185_v0 = vld [vmem:[%s3975_s12 + $0x48] sm:$0xff]   ;;  %v3187_v3 = vld [vmem:[%s3975_s12 + $0x40] sm:$0xff]  }
 0xd69   : > { %v2090_v5 = vpop.f32.mrf.mxu1  ;;  %2838 = vmatpush3.bf16.msra.mxu1 %v3184_v63 }
 0xd6a   : > { %v2095_v6 = vadd.f32 %v2090_v5, %v1694_v24  ;;  %v2105_v10 = vadd.f32 %v2708_v2, %v2096_v4  ;;  %2839 = vmatprep.subr.bf16.mxu1 %v3185_v0  ;;  %v3188_v4 = vld [vmem:[%s3975_s12] sm:$0xff]   ;;  %v2164_v5 = vsub.s32 0, %v3564_v7 }
 0xd6b   : > { %v3064_v11 = vpop.f32.mrf.mxu1 }
 0xd6c   : > { %v2097_v13 = vadd.f32 %v3238_v12, %v2095_v6  ;;  %v2107_v14 = vsel %vm442_vm0, %v2105_v10, 0.0  ;;  %v2160_v6 = vld [vmem:[%s3974_s11] sm:$0x3] }
 0xd6d   : > { %2108 = vadd.xlane.f32.xlu0 %v2107_v14  ;;  %v2165_v11 = vrot.slane %v2160_v6, %v2164_v5 }
 0xd6e   : > { %v2106_v16 = vadd.f32 %v2708_v2, %v2097_v13  ;;  %v3186_v2 = vld [vmem:[%s3975_s12 + $0x8] sm:$0xff]  }
 0xd6f   : > { %2840 = vmatpush3.bf16.msra.mxu1 %v3186_v2 }
 0xd70   : > { %v2110_v17 = vsel %vm442_vm0, %v2106_v16, 0.0  ;;  %2841 = vmatprep.subr.bf16.mxu1 %v3187_v3 }
 0xd71   : > { %2111 = vadd.xlane.f32.xlu1 %v2110_v17 }
 0xd73   : > { %2842 = vmatpush3.bf16.msra.mxu1 %v3188_v4 }
 0xdf6   : > { %v2109_v18 = vpop.xlane.xlu0 %2108 }
 0xdf7   : > { %v2113_v19 = vmul.f32 0.015625, %v2109_v18 }
 0xdf9   : > { %v2115_v20 = vsub.f32 %v2105_v10, %v2113_v19  ;;  %v2168_v10 = vsub.s32 1, %v3564_v7 }
 0xdfa   : > { %v2112_v21 = vpop.xlane.xlu1 %2111 }
 0xdfb   : > { %v2114_v22 = vmul.f32 0.015625, %v2112_v21  ;;  %v2117_v23 = vmul.f32 %v2115_v20, %v2115_v20  ;;  %v2169_v12 = vrot.slane %v2160_v6, %v2168_v10 }
 0xdfd   : > { %v2116_v25 = vsub.f32 %v2106_v16, %v2114_v22  ;;  %v2119_v24 = vsel %vm442_vm0, %v2117_v23, 0.0 }
 0xdfe   : > { %2120 = vadd.xlane.f32.xlu0 %v2119_v24 }
 0xdff   : > { %v2118_v40 = vmul.f32 %v2116_v25, %v2116_v25 }
 0xe01   : > { %v2122_v26 = vsel %vm442_vm0, %v2118_v40, 0.0 }
 0xe02   : > { %2123 = vadd.xlane.f32.xlu1 %v2122_v26 }
 0xe87   : > { %v2121_v34 = vpop.xlane.xlu0 %2120 }
 0xe88   : > { %v2125_v35 = vmul.f32 0.015625, %v2121_v34 }
 0xe8a   : > { %v2127_v36 = vadd.f32 1e-05, %v2125_v35 }
 0xe8b   : > { %v2124_v39 = vpop.xlane.xlu1 %2123 }
 0xe8c   : > { %3225 = vrsqrt.f32 %v2127_v36  ;;  %v2126_v41 = vmul.f32 0.015625, %v2124_v39 }
 0xe8e   : > { %v2128_v15 = vadd.f32 1e-05, %v2126_v41 }
 0xe90   : > { %3227 = vrsqrt.f32 %v2128_v15 }
 0xe99   : > { %v3226_v42 = vpop.eup %3225 }
 0xe9a   : > { %v2131_v43 = vmul.f32 %v3226_v42, %v2115_v20 }
 0xe9c   : > { %v2140_v47 = vmul.f32 %v2709_v44, %v2131_v43 }
 0xe9d   : > { %v3228_v45 = vpop.eup %3227 }
 0xe9e   : > { %v2132_v46 = vmul.f32 %v3228_v45, %v2116_v25  ;;  %v2149_v9 = vadd.f32 %v2710_v48, %v2140_v47 }
 0xea0   : > { %v2141_v8 = vmul.f32 %v2709_v44, %v2132_v46 }
 0xea2   : > { %v2150_v49 = vadd.f32 %v2710_v48, %v2141_v8 }
 0xea4   : > { %v2151_v50 = vpack.c.bf16 %v2150_v49, %v2149_v9 }
 0xea6   : > { %2719 = vmatmul.mubr.msk.bf16.vlgmr.msra.gmra.mxu0 %vm442_vm0, %v2151_v50 }
 0xf66   : > { %v2249_v13 = vpop.f32.mrf.mxu0 }
 0xf67   : > { %v2250_v14 = vadd.f32 %v2249_v13, %v2165_v11 }
 0xf68   : > { %v2251_v16 = vpop.f32.mrf.mxu0 }
 0xf69   : > { %v2262_v17 = vmul.f32 0.044715, %v2250_v14  ;;  %v2252_v18 = vadd.f32 %v2251_v16, %v2169_v12  ;;  %v2258_v49 = vmul.f32 0.5, %v2250_v14 }
 0xf6a   : > { %v2253_v19 = vpop.f32.mrf.mxu0 }
 0xf6b   : > { %v2266_v20 = vmul.f32 %v2262_v17, %v2250_v14  ;;  %v2263_v21 = vmul.f32 0.044715, %v2252_v18  ;;  %v2254_v22 = vadd.f32 %v2253_v19, %v2165_v11  ;;  %v2259_v48 = vmul.f32 0.5, %v2252_v18 }
 0xf6c   : > { %v2255_v23 = vpop.f32.mrf.mxu0 }
 0xf6d   : > { %v2270_v25 = vmul.f32 %v2266_v20, %v2250_v14  ;;  %v2267_v24 = vmul.f32 %v2263_v21, %v2252_v18  ;;  %v2264_v40 = vmul.f32 0.044715, %v2254_v22  ;;  %v2256_v26 = vadd.f32 %v2255_v23, %v2169_v12 }
 0xf6e   : > { %v2260_v46 = vmul.f32 0.5, %v2254_v22 }
 0xf6f   : > { %v2274_v27 = vadd.f32 %v2270_v25, %v2250_v14  ;;  %v2271_v28 = vmul.f32 %v2267_v24, %v2252_v18  ;;  %v2268_v29 = vmul.f32 %v2264_v40, %v2254_v22  ;;  %v2265_v7 = vmul.f32 0.044715, %v2256_v26 }
 0xf70   : > { %v2261_v8 = vmul.f32 0.5, %v2256_v26 }
 0xf71   : > { %v2272_v30 = vmul.f32 %v2268_v29, %v2254_v22  ;;  %v2269_v31 = vmul.f32 %v2265_v7, %v2256_v26  ;;  %v2275_v32 = vadd.f32 %v2271_v28, %v2252_v18  ;;  %v2278_v62 = vmul.f32 0.7978846, %v2274_v27 }
 0xf73   : > { %v2276_v1 = vadd.f32 %v2272_v30, %v2254_v22  ;;  %v2273_v33 = vmul.f32 %v2269_v31, %v2256_v26  ;;  %v2279_v34 = vmul.f32 0.7978846, %v2275_v32 }
 0xf75   : > { %v2280_v35 = vmul.f32 0.7978846, %v2276_v1  ;;  %v2277_v36 = vadd.f32 %v2273_v33, %v2256_v26  ;;  %3229 = vtanh.f32 %v2279_v34 }
 0xf76   : > { %3231 = vtanh.f32 %v2278_v62 }
 0xf77   : > { %3233 = vtanh.f32 %v2280_v35  ;;  %v2281_v39 = vmul.f32 0.7978846, %v2277_v36 }
 0xf79   : > { %3235 = vtanh.f32 %v2281_v39 }
 0xf82   : > { %v3230_v41 = vpop.eup %3229 }
 0xf83   : > { %v3232_v15 = vpop.eup %3231  ;;  %v2287_v43 = vadd.f32 1.0, %v3230_v41 }
 0xf84   : > { %v3234_v42 = vpop.eup %3233  ;;  %v2286_v47 = vadd.f32 1.0, %v3232_v15 }
 0xf85   : > { %v2288_v44 = vadd.f32 1.0, %v3234_v42  ;;  %v2291_v51 = vmul.f32 %v2287_v43, %v2259_v48 }
 0xf86   : > { %v3236_v45 = vpop.eup %3235  ;;  %v2290_v53 = vmul.f32 %v2286_v47, %v2258_v49 }
 0xf87   : > { %v2289_v9 = vadd.f32 1.0, %v3236_v45  ;;  %v2292_v50 = vmul.f32 %v2288_v44, %v2260_v46 }
 0xf89   : > { %v2293_v52 = vmul.f32 %v2289_v9, %v2261_v8  ;;  %v2294_v55 = vpack.c.bf16 %v2292_v50, %v2290_v53 }
 0xf8b   : > { %v2295_v54 = vpack.c.bf16 %v2293_v52, %v2291_v51 }
 0xf8d   : > { %2456 = vmatprep.mubr.bf16.mxu1 %v2295_v54 }
 0xf8e   : > { %2457 = vmatmul.mubr.bf16.vlgmr.msra.gmra.mxu1 %v2294_v55 }
0x104e   : > { %v2843_v56 = vpop.f32.mrf.mxu1 }
0x1050   : > { %v2844_v57 = vpop.f32.mrf.mxu1 }
0x1051   : > { %v2845_v58 = vadd.f32 %v2844_v57, %v2843_v56 }
0x1052   : > { %v2846_v59 = vpop.f32.mrf.mxu1 }
0x1053   : > { %v2465_v60 = vadd.f32 %v2845_v58, %v3482_v37 }
0x1054   : > { %v2847_v61 = vpop.f32.mrf.mxu1 }
0x1055   : > { %2467 = vst.msk [vmem:[%s433_s1] sm:$0xff] %vm442_vm0, %v2465_v60  ;;  %v2848_v63 = vadd.f32 %v2847_v61, %v2846_v59 }
0x1057   : > { %v2466_v0 = vadd.f32 %v2848_v63, %v3484_v38 }
0x1059   : > { %2468 = vst.msk [vmem:[%s433_s1 + $0x8] sm:$0xff] %vm442_vm0, %v2466_v0 }
0x105a   : > { %3252 = shalt.err (!%p3249_p3)
}
0x105b   : > { %s3253_s15 = scalar_lea.hbm %s3917_s23, 256  ;;  %s3257_s24 = scalar_lea.hbm %s3976_s13, 512 }
0x105c   : > { %p3254_p4 = scmp.ne.s32.totalorder %s3917_s23, %s3253_s15  ;;  %p3258_p9 = scmp.lt.s32.totalorder %s3917_s23, %s3976_s13 }
0x105d   : > { %p3259_p10 = scmp.lt.s32.totalorder %s3257_s24, %s3253_s15 }
0x105e   : > { %p3255_p7 = pnand %p3254_p4, %p3415_p5 }
0x105f   : > { %p3260_p11 = por %p3259_p10, %p3258_p9 }
0x1060   : > { %p3256_p8 = pneg %p3255_p7 }
0x1062   : > { %p3261_p12 = pnand %p3260_p11, %p3256_p8 }
0x1064   : > { %3264 = shalt.err (!%p3261_p12)
}
0x1065   : > { %s3305_s29 = smov 128   ;;  %s3306_s16 = smov 8  }
0x1066   : > { %3065 = dma.vmem_to_hbm [thread:$0]  (%p3415_p5), %s3919_s20, 256, %s3917_s23, %s3923_s30, %s3305_s29, %s3305_s29, %s3306_s16  }
0x1067 PF: > { %p3071_p13 = scmp.ge.s32.totalorder %s3299_s28, 2  ;;  %s2498_s21 = sand.u32 1, %s3287_s25  }
0x1068   : > { %s2499_s2 = scalar_lea.sflag [#allocation3], %s2498_s21 }
0x1069   : > { %p3068_p0 = pnand %p3071_p13, %p3419_p6 }
0x106b   : > { %p3069_p1 = pneg %p3068_p0 }
0x106d   : > { %3282 = dma.done.wait (%p3069_p1), %s2499_s2, 256  }
0x106e   : > { %3284 = vsyncadd (%p3069_p1), %s2499_s2, 4294967040  ;;  %p23_p2 = scmp.ge.s32.totalorder %s3402_s14, 4   ;;  %s3985_s25 = smov %s3291_s26 }
0x106f   : > { %s3986_s26 = smov %s3295_s27  ;;  %s3987_s27 = smov %s3413_s17 }
0x1070   : > { %s3988_s28 = smov %s3402_s14  ;;  %25 = sbr.rel (!%p23_p2) target bundleno = 7 (0x7), region = 119 }
0x1075   :  { %2504 = vsyncpa [#allocation3], 1 }
0x1076   :  { %2506 = vsyncpa [#allocation3 + $0x1], 1 }

</bundles_post_ra>
